<compile_context>
chip_gen: v7x
topology: tpu7x:2x2x1
jax: 0.10.0
libtpu: 0.0.40
codegen_flags: <defaults>
</compile_context>

<pallas_src>
import functools

import jax
import jax.numpy as jnp
from jax import lax
from jax.experimental import pallas as pl
from jax.experimental.pallas import tpu as pltpu


def _bottleneck_kernel(x_ref, xt_ref, xb_ref, w1_ref, b1_ref, w2_ref, b2_ref,
                       w3_ref, b3_ref, o_ref):
    """One (batch n, row-tile r) step of the fused Bottleneck block.

    x_ref : (1, TH, W, Cin)  bf16  main input rows (also the residual source)
    xt_ref: (1, 1,  W, Cin)  bf16  row above the tile (index clamped at top edge)
    xb_ref: (1, 1,  W, Cin)  bf16  row below the tile (index clamped at bottom edge)
    w1_ref: (Cin, P)         bf16  conv1 weight, BN1 scale folded in
    b1_ref: (1, P)           f32   BN1 shift
    w2_ref: (3P, 3P)         bf16  conv2 weight, W_cat[kx*P+c, ky*P+o], BN2 folded
    b2_ref: (1, P)           f32   BN2 shift
    w3_ref: (P, Cout)        bf16  conv3 weight, BN3 folded in
    b3_ref: (1, Cout)        f32   BN3 shift
    o_ref : (1, TH, W, Cout) f32   output rows
    """
    TH, W, Cin = x_ref.shape[1], x_ref.shape[2], x_ref.shape[3]
    P = w1_ref.shape[1]
    Cout = o_ref.shape[3]
    r = pl.program_id(1)
    nr = pl.num_programs(1)

    # ---- conv1 (1x1) + bn1 (folded) + relu: main rows and the 2 halo rows ----
    x_main = x_ref[0].reshape(TH * W, Cin)                          # bf16
    h1m = jnp.dot(x_main, w1_ref[...], preferred_element_type=jnp.float32)
    h1m = jnp.maximum(h1m + b1_ref[...], 0.0)                       # (TH*W, P) f32

    x_halo = jnp.concatenate([xt_ref[0, 0], xb_ref[0, 0]], axis=0)  # (2W, Cin)
    h1h = jnp.dot(x_halo, w1_ref[...], preferred_element_type=jnp.float32)
    h1h = jnp.maximum(h1h + b1_ref[...], 0.0)                       # (2W, P)

    # conv2's zero padding acts on h1 itself, so when the tile touches the
    # image top/bottom the halo rows must be exact zeros (not conv1(0)).
    top_ok = (r > 0).astype(jnp.float32)
    bot_ok = (r < nr - 1).astype(jnp.float32)
    h1_top = (h1h[:W] * top_ok).reshape(1, W, P)
    h1_bot = (h1h[W:] * bot_ok).reshape(1, W, P)

    hr = jnp.concatenate([h1_top, h1m.reshape(TH, W, P), h1_bot],
                         axis=0).astype(jnp.bfloat16)               # (TH+2, W, P)

    # ---- conv2 (3x3, pad=1) + bn2 + relu: ONE matmul with K = N = 3P ---------
    # im2col slab: slab[y, x, kx*P + c] = h1_xpad[y, x + kx, c]
    zcol = jnp.zeros((TH + 2, 1, P), jnp.bfloat16)
    hp = jnp.concatenate([zcol, hr, zcol], axis=1)                  # (TH+2, W+2, P)
    slab = jnp.concatenate(
        [hp[:, 0:W], hp[:, 1:W + 1], hp[:, 2:W + 2]], axis=-1)      # (TH+2, W, 3P)

    tmp = jnp.dot(slab.reshape((TH + 2) * W, 3 * P), w2_ref[...],
                  preferred_element_type=jnp.float32)
    tmp = tmp.reshape(TH + 2, W, 3 * P)
    # out2[y] = sum_ky tmp[y + ky, :, ky*P:(ky+1)*P]
    h2 = (tmp[0:TH, :, 0:P]
          + tmp[1:TH + 1, :, P:2 * P]
          + tmp[2:TH + 2, :, 2 * P:3 * P])                          # (TH, W, P)
    h2 = jnp.maximum(h2 + b2_ref[...], 0.0)

    # ---- conv3 (1x1) + bn3 (folded) + identity residual + relu ---------------
    h3 = jnp.dot(h2.reshape(TH * W, P).astype(jnp.bfloat16), w3_ref[...],
                 preferred_element_type=jnp.float32)                # (TH*W, Cout)
    out = jnp.maximum(h3 + b3_ref[...] + x_main.astype(jnp.float32), 0.0)
    o_ref[...] = out.reshape(1, TH, W, Cout).astype(o_ref.dtype)


def _pick_row_tile(h, max_rows=8):
    """Largest divisor of h that is <= max_rows (keeps halo/grid logic exact)."""
    for t in range(min(h, max_rows), 0, -1):
        if h % t == 0:
            return t
    return 1


def bottleneck_forward_nhwc(x_nhwc, params, eps=1e-5):
    """Fused Bottleneck forward on NHWC activations (preferred layout)."""
    N, H, W, Cin = x_nhwc.shape
    P = params["conv1_w"].shape[0]
    Cout = params["conv3_w"].shape[0]
    assert Cout == Cin == 4 * P, "identity residual requires inplanes == planes*4"

    TH = _pick_row_tile(H)
    R = H // TH

    def bn_fold(bn):
        gamma, beta, mean, var = bn
        scale = gamma * lax.rsqrt(var + eps)
        shift = beta - mean * scale
        return scale, shift

    s1, t1 = bn_fold(params["bn1"])
    s2, t2 = bn_fold(params["bn2"])
    s3, t3 = bn_fold(params["bn3"])

    # Fold BN scales into the (bias-free) conv weights; BN shifts become biases.
    # conv1: OIHW (P, Cin, 1, 1) -> (Cin, P)
    w1 = (params["conv1_w"][:, :, 0, 0] * s1[:, None]).T.astype(jnp.bfloat16)
    # conv2: OIHW (P, P, 3, 3) -> W_cat[kx*P + c, ky*P + o]
    w2f = params["conv2_w"] * s2[:, None, None, None]
    w2 = jnp.transpose(w2f, (3, 1, 2, 0)).reshape(3 * P, 3 * P).astype(jnp.bfloat16)
    # conv3: OIHW (Cout, P, 1, 1) -> (P, Cout)
    w3 = (params["conv3_w"][:, :, 0, 0] * s3[:, None]).T.astype(jnp.bfloat16)

    b1 = t1.reshape(1, P).astype(jnp.float32)
    b2 = t2.reshape(1, P).astype(jnp.float32)
    b3 = t3.reshape(1, Cout).astype(jnp.float32)

    # bf16 activations in HBM (residual is upcast to f32 inside the kernel).
    xh = x_nhwc.astype(jnp.bfloat16)

    flops = 2 * N * H * W * (Cin * P + 9 * P * P + P * Cout)
    bytes_accessed = int(
        N * H * W * Cin * 2            # main input (bf16)
        + N * R * 2 * W * Cin * 2      # halo rows (bf16)
        + N * H * W * Cout * 4         # output (f32)
        + (w1.size + w2.size + w3.size) * 2)

    kernel = pl.pallas_call(
        _bottleneck_kernel,
        out_shape=jax.ShapeDtypeStruct((N, H, W, Cout), jnp.float32),
        grid_spec=pltpu.PrefetchScalarGridSpec(
            num_scalar_prefetch=0,
            grid=(N, R),
            in_specs=[
                # main rows of the tile
                pl.BlockSpec((1, TH, W, Cin), lambda n, r: (n, r, 0, 0)),
                # 1-row halo above / below (block row size 1 -> block idx == row idx)
                pl.BlockSpec((1, 1, W, Cin),
                             lambda n, r: (n, jnp.maximum(r * TH - 1, 0), 0, 0)),
                pl.BlockSpec((1, 1, W, Cin),
                             lambda n, r: (n, jnp.minimum(r * TH + TH, H - 1), 0, 0)),
                # weights / biases: constant index maps -> stay VMEM-resident
                pl.BlockSpec((Cin, P), lambda n, r: (0, 0)),
                pl.BlockSpec((1, P), lambda n, r: (0, 0)),
                pl.BlockSpec((3 * P, 3 * P), lambda n, r: (0, 0)),
                pl.BlockSpec((1, P), lambda n, r: (0, 0)),
                pl.BlockSpec((P, Cout), lambda n, r: (0, 0)),
                pl.BlockSpec((1, Cout), lambda n, r: (0, 0)),
            ],
            out_specs=pl.BlockSpec((1, TH, W, Cout), lambda n, r: (n, r, 0, 0)),
        ),
        compiler_params=pltpu.CompilerParams(
            dimension_semantics=("parallel", "parallel"),
            vmem_limit_bytes=32 * 1024 * 1024,
        ),
        cost_estimate=pl.CostEstimate(
            flops=int(flops), transcendentals=0, bytes_accessed=bytes_accessed),
    )
    return kernel(xh, xh, xh, w1, b1, w2, b2, w3, b3)


def bottleneck_forward(x_nchw, params, eps=1e-5):
    """PyTorch-convention NCHW wrapper around the NHWC fused kernel."""
    # TODO(synk): when stacking Bottleneck blocks keep activations NHWC
    #             end-to-end and drop these HBM-round-trip transposes.
    x = jnp.transpose(x_nchw, (0, 2, 3, 1))
    y = bottleneck_forward_nhwc(x, params, eps=eps)
    return jnp.transpose(y, (0, 3, 1, 2))


def init_params(key, inplanes=256, planes=64):
    """Deterministic parameters for Bottleneck(inplanes, planes)."""
    keys = jax.random.split(key, 6)

    def conv_w(k, cout, cin, ksize):
        fan_in = cin * ksize * ksize
        std = (2.0 / fan_in) ** 0.5
        return std * jax.random.normal(k, (cout, cin, ksize, ksize), jnp.float32)

    def bn_p(k, c):
        k1, k2, k3, k4 = jax.random.split(k, 4)
        gamma = 1.0 + 0.1 * jax.random.normal(k1, (c,), jnp.float32)
        beta = 0.1 * jax.random.normal(k2, (c,), jnp.float32)
        mean = 0.1 * jax.random.normal(k3, (c,), jnp.float32)
        var = 1.0 + 0.1 * jax.random.uniform(k4, (c,), jnp.float32)
        return (gamma, beta, mean, var)

    return {
        "conv1_w": conv_w(keys[0], planes, inplanes, 1),
        "bn1": bn_p(keys[1], planes),
        "conv2_w": conv_w(keys[2], planes, planes, 3),
        "bn2": bn_p(keys[3], planes),
        "conv3_w": conv_w(keys[4], planes * 4, planes, 1),
        "bn3": bn_p(keys[5], planes * 4),
    }


def bottleneck_reference(x_nchw, params, eps=1e-5):
    """Plain-JAX f32 reference (lax.conv) matching the PyTorch module in eval mode."""
    def conv(x, w, pad=0):
        return lax.conv_general_dilated(
            x, w, window_strides=(1, 1), padding=((pad, pad), (pad, pad)),
            dimension_numbers=("NCHW", "OIHW", "NCHW"))

    def bn(x, p):
        gamma, beta, mean, var = p
        scale = gamma / jnp.sqrt(var + eps)
        shift = beta - mean * scale
        return x * scale[None, :, None, None] + shift[None, :, None, None]

    out = jax.nn.relu(bn(conv(x_nchw, params["conv1_w"]), params["bn1"]))
    out = jax.nn.relu(bn(conv(out, params["conv2_w"], pad=1), params["bn2"]))
    out = bn(conv(out, params["conv3_w"]), params["bn3"])
    return jax.nn.relu(out + x_nchw)  # downsample=None -> identity residual


if __name__ == "__main__":
    key = jax.random.PRNGKey(0)
    kp, kx = jax.random.split(key)

    inplanes, planes = 256, 64
    params = init_params(kp, inplanes=inplanes, planes=planes)

    # Small NCHW input consistent with Bottleneck(256, 64): (N=2, C=256, 16, 16).
    x = jax.random.normal(kx, (2, inplanes, 16, 16), jnp.float32)

    fwd = jax.jit(functools.partial(bottleneck_forward, params=params))
    out = jax.block_until_ready(fwd(x))
    assert out.shape == (2, inplanes, 16, 16), out.shape

    ref = jax.block_until_ready(bottleneck_reference(x, params))
    # bf16 MXU operands / bf16 HBM activations (f32 accumulation + f32 residual
    # epilogue) vs pure-f32 reference -> loose-ish tolerance.
    max_err = float(jnp.max(jnp.abs(out - ref)))
    assert jnp.allclose(out, ref, rtol=5e-2, atol=5e-2), max_err

    print("KERNEL_OK")
</pallas_src>

<mosaic_0001>
module attributes {stable_mosaic.version = 11 : i64} {
  func.func @_bottleneck_kernel(%arg0: i32, %arg1: i32, %arg2: memref<1x8x16x256xbf16, #tpu.memory_space<vmem>>, %arg3: memref<1x1x16x256xbf16, #tpu.memory_space<vmem>>, %arg4: memref<1x1x16x256xbf16, #tpu.memory_space<vmem>>, %arg5: memref<256x64xbf16, #tpu.memory_space<vmem>>, %arg6: memref<1x64xf32, #tpu.memory_space<vmem>>, %arg7: memref<192x192xbf16, #tpu.memory_space<vmem>>, %arg8: memref<1x64xf32, #tpu.memory_space<vmem>>, %arg9: memref<64x256xbf16, #tpu.memory_space<vmem>>, %arg10: memref<1x256xf32, #tpu.memory_space<vmem>>, %arg11: memref<1x8x16x256xf32, #tpu.memory_space<vmem>>) attributes {dimension_semantics = [#tpu.dimension_semantics<parallel>, #tpu.dimension_semantics<parallel>], iteration_bounds = array<i64: 2, 2>, scalar_prefetch = 0 : i64, scratch_operands = 0 : i64, tpu.core_type = #tpu.core_type<tc>, window_params = [{transform_indices = @transform_0, window_bounds = array<i64: 1, 8, 16, 256>}, {transform_indices = @transform_1, window_bounds = array<i64: 1, 1, 16, 256>}, {transform_indices = @transform_2, window_bounds = array<i64: 1, 1, 16, 256>}, {pipeline_mode = #tpu.pipeline_mode<synchronous>, transform_indices = @transform_3, window_bounds = array<i64: 256, 64>}, {pipeline_mode = #tpu.pipeline_mode<synchronous>, transform_indices = @transform_4, window_bounds = array<i64: 1, 64>}, {pipeline_mode = #tpu.pipeline_mode<synchronous>, transform_indices = @transform_5, window_bounds = array<i64: 192, 192>}, {pipeline_mode = #tpu.pipeline_mode<synchronous>, transform_indices = @transform_6, window_bounds = array<i64: 1, 64>}, {pipeline_mode = #tpu.pipeline_mode<synchronous>, transform_indices = @transform_7, window_bounds = array<i64: 64, 256>}, {pipeline_mode = #tpu.pipeline_mode<synchronous>, transform_indices = @transform_8, window_bounds = array<i64: 1, 256>}, {transform_indices = @transform_9, window_bounds = array<i64: 1, 8, 16, 256>}]} {
    %c0 = arith.constant 0 : index
    %c0_0 = arith.constant 0 : index
    %c0_1 = arith.constant 0 : index
    %c0_2 = arith.constant 0 : index
    %0 = vector.load %arg2[%c0, %c0_0, %c0_1, %c0_2] : memref<1x8x16x256xbf16, #tpu.memory_space<vmem>>, vector<1x8x16x256xbf16>
    %1 = vector.shape_cast %0 : vector<1x8x16x256xbf16> to vector<8x16x256xbf16>
    %2 = vector.shape_cast %1 : vector<8x16x256xbf16> to vector<128x256xbf16>
    %c0_3 = arith.constant 0 : index
    %c0_4 = arith.constant 0 : index
    %3 = vector.load %arg5[%c0_3, %c0_4] : memref<256x64xbf16, #tpu.memory_space<vmem>>, vector<256x64xbf16>
    %cst = arith.constant dense<0.000000e+00> : vector<128x64xf32>
    %4 = tpu.matmul %2, %3, %cst {dimension_numbers = #tpu.dot_dimension_numbers<[1], [0], [0], [1], [0, 0, 1, 1], [], []>} : vector<128x256xbf16>, vector<256x64xbf16>, vector<128x64xf32> -> vector<128x64xf32>
    %c0_5 = arith.constant 0 : index
    %c0_6 = arith.constant 0 : index
    %5 = vector.load %arg6[%c0_5, %c0_6] : memref<1x64xf32, #tpu.memory_space<vmem>>, vector<1x64xf32>
    %6 = vector.broadcast %5 : vector<1x64xf32> to vector<128x64xf32>
    %7 = arith.addf %4, %6 : vector<128x64xf32>
    %cst_7 = arith.constant 0.000000e+00 : f32
    %8 = vector.broadcast %cst_7 : f32 to vector<128x64xf32>
    %9 = arith.maximumf %7, %8 : vector<128x64xf32>
    %c0_8 = arith.constant 0 : index
    %c0_9 = arith.constant 0 : index
    %c0_10 = arith.constant 0 : index
    %c0_11 = arith.constant 0 : index
    %10 = vector.load %arg3[%c0_8, %c0_9, %c0_10, %c0_11] : memref<1x1x16x256xbf16, #tpu.memory_space<vmem>>, vector<1x1x16x256xbf16>
    %11 = vector.shape_cast %10 : vector<1x1x16x256xbf16> to vector<16x256xbf16>
    %c0_12 = arith.constant 0 : index
    %c0_13 = arith.constant 0 : index
    %c0_14 = arith.constant 0 : index
    %c0_15 = arith.constant 0 : index
    %12 = vector.load %arg4[%c0_12, %c0_13, %c0_14, %c0_15] : memref<1x1x16x256xbf16, #tpu.memory_space<vmem>>, vector<1x1x16x256xbf16>
    %13 = vector.shape_cast %12 : vector<1x1x16x256xbf16> to vector<16x256xbf16>
    %14 = tpu.concatenate %11, %13 in 0 : vector<16x256xbf16>, vector<16x256xbf16> -> vector<32x256xbf16>
    %c0_16 = arith.constant 0 : index
    %c0_17 = arith.constant 0 : index
    %15 = vector.load %arg5[%c0_16, %c0_17] : memref<256x64xbf16, #tpu.memory_space<vmem>>, vector<256x64xbf16>
    %cst_18 = arith.constant dense<0.000000e+00> : vector<32x64xf32>
    %16 = tpu.matmul %14, %15, %cst_18 {dimension_numbers = #tpu.dot_dimension_numbers<[1], [0], [0], [1], [0, 0, 1, 1], [], []>} : vector<32x256xbf16>, vector<256x64xbf16>, vector<32x64xf32> -> vector<32x64xf32>
    %c0_19 = arith.constant 0 : index
    %c0_20 = arith.constant 0 : index
    %17 = vector.load %arg6[%c0_19, %c0_20] : memref<1x64xf32, #tpu.memory_space<vmem>>, vector<1x64xf32>
    %18 = vector.broadcast %17 : vector<1x64xf32> to vector<32x64xf32>
    %19 = arith.addf %16, %18 : vector<32x64xf32>
    %cst_21 = arith.constant 0.000000e+00 : f32
    %20 = vector.broadcast %cst_21 : f32 to vector<32x64xf32>
    %21 = arith.maximumf %19, %20 : vector<32x64xf32>
    %c0_i32 = arith.constant 0 : i32
    %22 = arith.cmpi sgt, %arg1, %c0_i32 : i32
    %23 = arith.extui %22 : i1 to i32
    %24 = arith.sitofp %23 : i32 to f32
    %c1_i32 = arith.constant 1 : i32
    %25 = arith.cmpi slt, %arg1, %c1_i32 : i32
    %26 = arith.extui %25 : i1 to i32
    %27 = arith.sitofp %26 : i32 to f32
    %28 = vector.extract_strided_slice %21 {offsets = [0, 0], sizes = [16, 64], strides = [1, 1]} : vector<32x64xf32> to vector<16x64xf32>
    %29 = vector.broadcast %24 : f32 to vector<16x64xf32>
    %30 = arith.mulf %28, %29 : vector<16x64xf32>
    %31 = vector.shape_cast %30 : vector<16x64xf32> to vector<1x16x64xf32>
    %32 = vector.extract_strided_slice %21 {offsets = [16, 0], sizes = [16, 64], strides = [1, 1]} : vector<32x64xf32> to vector<16x64xf32>
    %33 = vector.broadcast %27 : f32 to vector<16x64xf32>
    %34 = arith.mulf %32, %33 : vector<16x64xf32>
    %35 = vector.shape_cast %34 : vector<16x64xf32> to vector<1x16x64xf32>
    %36 = vector.shape_cast %9 : vector<128x64xf32> to vector<8x16x64xf32>
    %37 = tpu.concatenate %31, %36, %35 in 0 : vector<1x16x64xf32>, vector<8x16x64xf32>, vector<1x16x64xf32> -> vector<10x16x64xf32>
    %38 = arith.truncf %37 : vector<10x16x64xf32> to vector<10x16x64xbf16>
    %cst_22 = arith.constant 0.000000e+00 : bf16
    %39 = vector.broadcast %cst_22 : bf16 to vector<10x1x64xbf16>
    %40 = tpu.concatenate %39, %38, %39 in 1 : vector<10x1x64xbf16>, vector<10x16x64xbf16>, vector<10x1x64xbf16> -> vector<10x18x64xbf16>
    %41 = vector.extract_strided_slice %40 {offsets = [0, 0, 0], sizes = [10, 16, 64], strides = [1, 1, 1]} : vector<10x18x64xbf16> to vector<10x16x64xbf16>
    %42 = vector.extract_strided_slice %40 {offsets = [0, 1, 0], sizes = [10, 16, 64], strides = [1, 1, 1]} : vector<10x18x64xbf16> to vector<10x16x64xbf16>
    %43 = vector.extract_strided_slice %40 {offsets = [0, 2, 0], sizes = [10, 16, 64], strides = [1, 1, 1]} : vector<10x18x64xbf16> to vector<10x16x64xbf16>
    %44 = tpu.concatenate %41, %42, %43 in 2 : vector<10x16x64xbf16>, vector<10x16x64xbf16>, vector<10x16x64xbf16> -> vector<10x16x192xbf16>
    %45 = vector.shape_cast %44 : vector<10x16x192xbf16> to vector<160x192xbf16>
    %c0_23 = arith.constant 0 : index
    %c0_24 = arith.constant 0 : index
    %46 = vector.load %arg7[%c0_23, %c0_24] : memref<192x192xbf16, #tpu.memory_space<vmem>>, vector<192x192xbf16>
    %cst_25 = arith.constant dense<0.000000e+00> : vector<160x192xf32>
    %47 = tpu.matmul %45, %46, %cst_25 {dimension_numbers = #tpu.dot_dimension_numbers<[1], [0], [0], [1], [0, 0, 1, 1], [], []>} : vector<160x192xbf16>, vector<192x192xbf16>, vector<160x192xf32> -> vector<160x192xf32>
    %48 = vector.shape_cast %47 : vector<160x192xf32> to vector<10x16x192xf32>
    %49 = vector.extract_strided_slice %48 {offsets = [0, 0, 0], sizes = [8, 16, 64], strides = [1, 1, 1]} : vector<10x16x192xf32> to vector<8x16x64xf32>
    %50 = vector.extract_strided_slice %48 {offsets = [1, 0, 64], sizes = [8, 16, 64], strides = [1, 1, 1]} : vector<10x16x192xf32> to vector<8x16x64xf32>
    %51 = arith.addf %49, %50 : vector<8x16x64xf32>
    %52 = vector.extract_strided_slice %48 {offsets = [2, 0, 128], sizes = [8, 16, 64], strides = [1, 1, 1]} : vector<10x16x192xf32> to vector<8x16x64xf32>
    %53 = arith.addf %51, %52 : vector<8x16x64xf32>
    %c0_26 = arith.constant 0 : index
    %c0_27 = arith.constant 0 : index
    %54 = vector.load %arg8[%c0_26, %c0_27] : memref<1x64xf32, #tpu.memory_space<vmem>>, vector<1x64xf32>
    %55 = vector.shape_cast %54 : vector<1x64xf32> to vector<1x1x64xf32>
    %56 = vector.broadcast %55 : vector<1x1x64xf32> to vector<8x16x64xf32>
    %57 = arith.addf %53, %56 : vector<8x16x64xf32>
    %cst_28 = arith.constant 0.000000e+00 : f32
    %58 = vector.broadcast %cst_28 : f32 to vector<8x16x64xf32>
    %59 = arith.maximumf %57, %58 : vector<8x16x64xf32>
    %60 = vector.shape_cast %59 : vector<8x16x64xf32> to vector<128x64xf32>
    %61 = arith.truncf %60 : vector<128x64xf32> to vector<128x64xbf16>
    %c0_29 = arith.constant 0 : index
    %c0_30 = arith.constant 0 : index
    %62 = vector.load %arg9[%c0_29, %c0_30] : memref<64x256xbf16, #tpu.memory_space<vmem>>, vector<64x256xbf16>
    %cst_31 = arith.constant dense<0.000000e+00> : vector<128x256xf32>
    %63 = tpu.matmul %61, %62, %cst_31 {dimension_numbers = #tpu.dot_dimension_numbers<[1], [0], [0], [1], [0, 0, 1, 1], [], []>} : vector<128x64xbf16>, vector<64x256xbf16>, vector<128x256xf32> -> vector<128x256xf32>
    %c0_32 = arith.constant 0 : index
    %c0_33 = arith.constant 0 : index
    %64 = vector.load %arg10[%c0_32, %c0_33] : memref<1x256xf32, #tpu.memory_space<vmem>>, vector<1x256xf32>
    %65 = vector.broadcast %64 : vector<1x256xf32> to vector<128x256xf32>
    %66 = arith.addf %63, %65 : vector<128x256xf32>
    %67 = arith.extf %2 : vector<128x256xbf16> to vector<128x256xf32>
    %68 = arith.addf %66, %67 : vector<128x256xf32>
    %cst_34 = arith.constant 0.000000e+00 : f32
    %69 = vector.broadcast %cst_34 : f32 to vector<128x256xf32>
    %70 = arith.maximumf %68, %69 : vector<128x256xf32>
    %71 = vector.shape_cast %70 : vector<128x256xf32> to vector<1x8x16x256xf32>
    %c0_35 = arith.constant 0 : index
    %c0_36 = arith.constant 0 : index
    %c0_37 = arith.constant 0 : index
    %c0_38 = arith.constant 0 : index
    %72 = vector.load %arg11[%c0_35, %c0_36, %c0_37, %c0_38] : memref<1x8x16x256xf32, #tpu.memory_space<vmem>>, vector<1x8x16x256xf32>
    tpu.vector_store %arg11[%c0_35, %c0_36, %c0_37, %c0_38], %71 {strides = array<i32>} : memref<1x8x16x256xf32, #tpu.memory_space<vmem>>, vector<1x8x16x256xf32>,
    return
  }
  func.func @transform_0(%arg0: i32, %arg1: i32) -> (i32, i32, i32, i32) {
    %c0_i32 = arith.constant 0 : i32
    %c0_i32_0 = arith.constant 0 : i32
    %c0_i32_1 = arith.constant 0 : i32
    return %arg0, %arg1, %c0_i32, %c0_i32_0 : i32, i32, i32, i32
  }
  func.func @transform_1(%arg0: i32, %arg1: i32) -> (i32, i32, i32, i32) {
    %c8_i32 = arith.constant 8 : i32
    %0 = arith.muli %arg1, %c8_i32 : i32
    %c1_i32 = arith.constant 1 : i32
    %1 = arith.subi %0, %c1_i32 : i32
    %c0_i32 = arith.constant 0 : i32
    %2 = arith.maxsi %1, %c0_i32 : i32
    %c0_i32_0 = arith.constant 0 : i32
    %c0_i32_1 = arith.constant 0 : i32
    %c0_i32_2 = arith.constant 0 : i32
    return %arg0, %2, %c0_i32_0, %c0_i32_1 : i32, i32, i32, i32
  }
  func.func @transform_2(%arg0: i32, %arg1: i32) -> (i32, i32, i32, i32) {
    %c8_i32 = arith.constant 8 : i32
    %0 = arith.muli %arg1, %c8_i32 : i32
    %c8_i32_0 = arith.constant 8 : i32
    %1 = arith.addi %0, %c8_i32_0 : i32
    %c15_i32 = arith.constant 15 : i32
    %2 = arith.minsi %1, %c15_i32 : i32
    %c0_i32 = arith.constant 0 : i32
    %c0_i32_1 = arith.constant 0 : i32
    %c0_i32_2 = arith.constant 0 : i32
    return %arg0, %2, %c0_i32, %c0_i32_1 : i32, i32, i32, i32
  }
  func.func @transform_3(%arg0: i32, %arg1: i32) -> (i32, i32) {
    %c0_i32 = arith.constant 0 : i32
    %c0_i32_0 = arith.constant 0 : i32
    %c0_i32_1 = arith.constant 0 : i32
    return %c0_i32, %c0_i32_0 : i32, i32
  }
  func.func @transform_4(%arg0: i32, %arg1: i32) -> (i32, i32) {
    %c0_i32 = arith.constant 0 : i32
    %c0_i32_0 = arith.constant 0 : i32
    %c0_i32_1 = arith.constant 0 : i32
    return %c0_i32, %c0_i32_0 : i32, i32
  }
  func.func @transform_5(%arg0: i32, %arg1: i32) -> (i32, i32) {
    %c0_i32 = arith.constant 0 : i32
    %c0_i32_0 = arith.constant 0 : i32
    %c0_i32_1 = arith.constant 0 : i32
    return %c0_i32, %c0_i32_0 : i32, i32
  }
  func.func @transform_6(%arg0: i32, %arg1: i32) -> (i32, i32) {
    %c0_i32 = arith.constant 0 : i32
    %c0_i32_0 = arith.constant 0 : i32
    %c0_i32_1 = arith.constant 0 : i32
    return %c0_i32, %c0_i32_0 : i32, i32
  }
  func.func @transform_7(%arg0: i32, %arg1: i32) -> (i32, i32) {
    %c0_i32 = arith.constant 0 : i32
    %c0_i32_0 = arith.constant 0 : i32
    %c0_i32_1 = arith.constant 0 : i32
    return %c0_i32, %c0_i32_0 : i32, i32
  }
  func.func @transform_8(%arg0: i32, %arg1: i32) -> (i32, i32) {
    %c0_i32 = arith.constant 0 : i32
    %c0_i32_0 = arith.constant 0 : i32
    %c0_i32_1 = arith.constant 0 : i32
    return %c0_i32, %c0_i32_0 : i32, i32
  }
  func.func @transform_9(%arg0: i32, %arg1: i32) -> (i32, i32, i32, i32) {
    %c0_i32 = arith.constant 0 : i32
    %c0_i32_0 = arith.constant 0 : i32
    %c0_i32_1 = arith.constant 0 : i32
    return %arg0, %arg1, %c0_i32, %c0_i32_0 : i32, i32, i32, i32
  }
}

</mosaic_0001>

<bundles_post_ra>
// kernel: bottleneck_forward.1
= control target key start
LH: loop header
LB: loop body
LE: loop exit
PB: predicated region body
PF: predicated region fallthrough
CT: control target
= control target key end

     0   :  { %14 = vsyncpa [#allocation3], 0  ;;  %s3493_s0 = inlined_call_operand.vmem [shape: bf16[2,16,16,256], index: 0, kind: input, shape index: {}, may-alias: {0,1,2}]   ;;  %s3494_s1 = inlined_call_operand.vmem [shape: bf16[2,16,16,256], index: 1, kind: input, shape index: {}, may-alias: {0,1,2}]   ;;  %s3495_s2 = inlined_call_operand.vmem [shape: bf16[2,16,16,256], index: 2, kind: input, shape index: {}, may-alias: {0,1,2}]   ;;  %s3496_s3 = inlined_call_operand.vmem [shape: bf16[256,64], index: 3, kind: input, shape index: {}]   ;;  %s3497_s4 = inlined_call_operand.vmem [shape: f32[1,64], index: 4, kind: input, shape index: {}]   ;;  %s3498_s5 = inlined_call_operand.vmem [shape: bf16[192,192], index: 5, kind: input, shape index: {}]   ;;  %s3499_s6 = inlined_call_operand.vmem [shape: f32[1,64], index: 6, kind: input, shape index: {}]   ;;  %s3500_s7 = inlined_call_operand.vmem [shape: bf16[64,256], index: 7, kind: input, shape index: {}]   ;;  %s3501_s8 = inlined_call_operand.vmem [shape: f32[1,256], index: 8, kind: input, shape index: {}]   ;;  %s3502_s9 = inlined_call_operand.hbm [shape: f32[2,16,16,256], index: 9, kind: output, shape index: {}]  }
   0x1   :  { %16 = vsyncpa [#allocation3 + $0x1], 0  ;;  %s2733_s30 = smov 0   ;;  %s2735_s10 = smov 0  }
   0x2   :  { %s2737_s11 = smov 0   ;;  %s2739_s12 = smov 0  }
   0x3   :  { %s2741_s13 = smov 0   ;;  %s2743_s14 = smov 0  }
   0x4   :  { %s2745_s15 = smov 0   ;;  %s2747_s16 = smov 0  }
   0x5 LB: > { %3508 = sst [smem:[#allocation5_spill]] %s2656_s11  ;;  %s2182_s17 = sadd.s32 4294967295, %s2676_s16   ;;  %s2676_s16 = sphi %s2747_s16, %s22_s16   ;;  %s2672_s15 = sphi %s2745_s15, %s3524_s15   ;;  %s2668_s14 = sphi %s2743_s14, %s3523_s14   ;;  %s2664_s13 = sphi %s2741_s13, %s3522_s13   ;;  %s2660_s12 = sphi %s2739_s12, %s3521_s12   ;;  %s2656_s11 = sphi %s2737_s11, %s3520_s11   ;;  %s2652_s10 = sphi %s2735_s10, %s3526_s10   ;;  %s2648_s30 = sphi %s2733_s30, %s3525_s30  }
   0x6   : > { %3509 = sst [smem:[#allocation6_spill]] %s2668_s14  ;;  %s2183_s18 = sadd.s32 4294967294, %s2676_s16  }
   0x7   : > { %3510 = sst [smem:[#allocation7_spill]] %s2672_s15  ;;  %s31_s19 = sadd.s32 1, %s2668_s14 }
   0x8   : > { %p32_p0 = scmp.ge.s32.totalorder %s31_s19, 2  ;;  %s34_s20 = sadd.s32 1, %s2672_s15 }
   0x9   : > { %p279_p1 = scmp.ne.s32.totalorder %s2656_s11, %s2652_s10  ;;  %p280_p2 = scmp.eq.s32.totalorder %s2182_s17, 3 }
   0xa   : > { %s3528_s19 = smov (%p32_p0, %s31_s19), 0  ;;  %s3530_s20 = smov (!%p32_p0, %s34_s20), %s2672_s15 }
   0xb   : > { %3511 = sst [smem:[#allocation8_spill]] %s3528_s19  ;;  %s265_s21 = ssub.s32 %s2668_s14, %s3528_s19 }
   0xc   : > { %p2784_p3 = por %p280_p2, %p279_p1  ;;  %p36_p4 = scmp.ge.s32.totalorder %s3530_s20, 2 }
   0xd   : > { %p285_p5 = scmp.ne.s32.totalorder %s2652_s10, %s2648_s30  ;;  %p286_p6 = scmp.eq.s32.totalorder %s2183_s18, 3 }
   0xe   : > { %p2192_p7 = scmp.ge.s32.totalorder %s2676_s16, 1  ;;  %s3532_s20 = smov (%p36_p4, %s3530_s20), 0 }
   0xf   : > { %3513 = sst [smem:[#allocation9_spill]] %s3532_s20  ;;  %p2793_p8 = por %p286_p6, %p285_p5 }
  0x10   : > { %p376_p9 = scmp.lt.s32.totalorder %s2676_s16, 5  ;;  %s264_s24 = ssub.s32 %s2672_s15, %s3532_s20 }
  0x11   : > { %s269_s25 = sadd.s32 1, %s2656_s11  ;;  %s266_s26 = sor.u32 %s265_s21, %s264_s24 }
  0x12   : > { %p377_p10 = pnand %p2192_p7, %p376_p9  ;;  %p267_p11 = scmp.eq.s32.totalorder %s266_s26, 0 }
  0x13   : > { %v2480_v0 = vld [vmem:[%s3496_s3 + $0x40] sm:$0xff] (!%p377_p10)   ;;  %s2808_s17 = sshll.u32 (!%p377_p10), %s2660_s12, 3  ;;  %p444_p12 = scmp.lt.s32.totalorder (!%p377_p10), %s2664_s13, 1  ;;  %v2482_v2 = vld [vmem:[%s3496_s3 + $0x48] sm:$0xff] (!%p377_p10)   ;;  %v2484_v4 = vld [vmem:[%s3496_s3 + $0x50] sm:$0xff] (!%p377_p10)   ;;  %vm1023_vm0 = vcmask (!%p377_p10), 1040384  }
  0x14   : > { %s2802_s27 = scalar_select %p267_p11, %s2656_s11, %s269_s25  }
  0x15   : > { %380 = sbr.rel (%p377_p10) target bundleno = 1047 (0x417), region = 56  ;;  %v2481_v1 = vld [vmem:[%s3496_s3] sm:$0xff] (!%p377_p10)   ;;  %2313 = vmatprep.subr.bf16.mxu0 (!%p377_p10), %v2480_v0  ;;  %2377 = vmatprep.subr.bf16.mxu1 (!%p377_p10), %v2480_v0  ;;  %p446_p13 = scmp.lt.s32.totalorder (!%p377_p10), %s2808_s17, 15  ;;  %v2483_v3 = vld [vmem:[%s3496_s3 + $0x8] sm:$0xff] (!%p377_p10)   ;;  %v2485_v5 = vld [vmem:[%s3496_s3 + $0x10] sm:$0xff] (!%p377_p10)   ;;  %vm1207_vm3 = vcmask (!%p377_p10), 1046528  }
  0x16   : > { %3515 = sst [smem:[#allocation10_spill]] %s2802_s27  ;;  %2314 = vmatpush3.bf16.msra.mxu0 (!%p377_p10), %v2481_v1  ;;  %2378 = vmatpush3.bf16.msra.mxu1 (!%p377_p10), %v2481_v1  ;;  %s2199_s26 = sadd.s32 (!%p377_p10), 4294967295, %s2808_s17  ;;  %v2486_v6 = vld [vmem:[%s3496_s3 + $0x58] sm:$0xff] (!%p377_p10)   ;;  %v2488_v8 = vld [vmem:[%s3496_s3 + $0x60] sm:$0xff] (!%p377_p10)   ;;  %v2490_v10 = vld [vmem:[%s3496_s3 + $0x68] sm:$0xff] (!%p377_p10)   ;;  %vm1238_vm4 = vcmask (!%p377_p10), 523264  }
  0x17   : > { %2315 = vmatprep.subr.bf16.mxu0 (!%p377_p10), %v2482_v2  ;;  %2379 = vmatprep.subr.bf16.mxu1 (!%p377_p10), %v2482_v2  ;;  %p456_p0 = scmp.gt.s32.totalorder (!%p377_p10), %s2199_s26, 0  ;;  %p2200_p1 = scmp.lt.s32.totalorder (!%p377_p10), %s2199_s26, 15  ;;  %v2487_v7 = vld [vmem:[%s3496_s3 + $0x18] sm:$0xff] (!%p377_p10)   ;;  %v2489_v9 = vld [vmem:[%s3496_s3 + $0x20] sm:$0xff] (!%p377_p10)   ;;  %v2491_v14 = vld [vmem:[%s3496_s3 + $0x28] sm:$0xff] (!%p377_p10)  }
  0x18   : > { %s472_s24 = sadd.s32 (!%p377_p10), 8, %s2808_s17  ;;  %v2492_v15 = vld [vmem:[%s3496_s3 + $0x70] sm:$0xff] (!%p377_p10)   ;;  %v2494_v18 = vld [vmem:[%s3496_s3 + $0x78] sm:$0xff] (!%p377_p10)   ;;  %v2518_v52 = vld [vmem:[%s3498_s5] ss:$8 sps:$4 sm:$0xff] (!%p377_p10)   ;;  %p911_p4 = scmp.gt.s32.totalorder (!%p377_p10), %s2660_s12, 0 }
  0x19   : > { %p2851_p2 = scmp.lt.s32.totalorder (!%p377_p10), %s472_s24, 15  ;;  %v2493_v17 = vld [vmem:[%s3496_s3 + $0x30] sm:$0xff] (!%p377_p10)   ;;  %v2495_v19 = vld [vmem:[%s3496_s3 + $0x38] sm:$0xff] (!%p377_p10)   ;;  %v2520_v53 = vld [vmem:[%s3498_s5 + $0x4] ss:$8 sps:$4 sm:$0xff] (!%p377_p10)   ;;  %p914_p5 = scmp.lt.s32.totalorder (!%p377_p10), %s2660_s12, 1 }
  0x1a   : > { %2316 = vmatpush3.bf16.msra.mxu0 (!%p377_p10), %v2483_v3  ;;  %2380 = vmatpush3.bf16.msra.mxu1 (!%p377_p10), %v2483_v3  ;;  %v2523_v54 = vld [vmem:[%s3498_s5 + $0x14] ss:$8 sps:$4 sm:$0xff] (!%p377_p10)   ;;  %v2521_v55 = vld [vmem:[%s3498_s5 + $0x10] ss:$8 sps:$4 sm:$0xff] (!%p377_p10)   ;;  %v2526_v56 = vld [vmem:[%s3498_s5 + $0x24] ss:$8 sps:$4 sm:$0xff] (!%p377_p10)  }
  0x1b   : > { %2317 = vmatprep.subr.bf16.mxu0 (!%p377_p10), %v2484_v4  ;;  %2381 = vmatprep.subr.bf16.mxu1 (!%p377_p10), %v2484_v4  ;;  %v2524_v57 = vld [vmem:[%s3498_s5 + $0x20] ss:$8 sps:$4 sm:$0xff] (!%p377_p10)   ;;  %v2529_v58 = vld [vmem:[%s3498_s5 + $0x34] ss:$8 sps:$4 sm:$0xff] (!%p377_p10)   ;;  %v2527_v59 = vld [vmem:[%s3498_s5 + $0x30] ss:$8 sps:$4 sm:$0xff] (!%p377_p10)  }
  0x1c   : > { %s445_s28 = scalar_select %p444_p12, %s2664_s13, 1  ;;  %v2532_v60 = vld [vmem:[%s3498_s5 + $0x44] ss:$8 sps:$4 sm:$0xff]   ;;  %v2530_v61 = vld [vmem:[%s3498_s5 + $0x40] ss:$8 sps:$4 sm:$0xff]  }
  0x1d   : > { %s447_s18 = scalar_select %p446_p13, %s2808_s17, 15  ;;  %v2535_v62 = vld [vmem:[%s3498_s5 + $0x54] ss:$8 sps:$4 sm:$0xff]   ;;  %v2533_v63 = vld [vmem:[%s3498_s5 + $0x50] ss:$8 sps:$4 sm:$0xff]  }
  0x1e   : > { %s2826_s20 = sshll.u32 %s445_s28, 6  ;;  %2318 = vmatpush3.bf16.msra.mxu0 %v2485_v5  ;;  %2382 = vmatpush3.bf16.msra.mxu1 %v2485_v5  ;;  %s3534_s26 = smov (!%p456_p0, %s2199_s26), 0  ;;  %v2538_v0 = vld [vmem:[%s3498_s5 + $0x64] ss:$8 sps:$4 sm:$0xff]   ;;  %v2536_v1 = vld [vmem:[%s3498_s5 + $0x60] ss:$8 sps:$4 sm:$0xff]  }
  0x1f   : > { %s2195_s21 = sshll.u32 %s447_s18, 2  ;;  %2319 = vmatprep.subr.bf16.mxu0 %v2486_v6  ;;  %2383 = vmatprep.subr.bf16.mxu1 %v2486_v6  ;;  %s3536_s26 = smov (!%p2200_p1, %s3534_s26), 15  ;;  %v2541_v2 = vld [vmem:[%s3498_s5 + $0x74] ss:$8 sps:$4 sm:$0xff]   ;;  %v2539_v3 = vld [vmem:[%s3498_s5 + $0x70] ss:$8 sps:$4 sm:$0xff]  }
  0x20   : > { %s450_s25 = sadd.s32 %s2826_s20, %s2195_s21  ;;  %s2205_s29 = sshll.u32 %s3536_s26, 2  ;;  %v2544_v4 = vld [vmem:[%s3498_s5 + $0x84] ss:$8 sps:$4 sm:$0xff]   ;;  %v2542_v5 = vld [vmem:[%s3498_s5 + $0x80] ss:$8 sps:$4 sm:$0xff]  }
  0x21   : > { %s2197_s19 = sshll.u32 %s450_s25, 2  ;;  %s464_s17 = sadd.s32 %s2205_s29, %s2826_s20  ;;  %v2547_v6 = vld [vmem:[%s3498_s5 + $0x94] ss:$8 sps:$4 sm:$0xff]   ;;  %vm1024_vm1 = vsmask.f32 256 }
  0x22   : > { %s2845_s27 = scalar_lea.vmem %s3493_s0, %s2197_s19  ;;  %2320 = vmatpush3.bf16.msra.mxu0 %v2487_v7  ;;  %2384 = vmatpush3.bf16.msra.mxu1 %v2487_v7  ;;  %s2207_s18 = sshll.u32 %s464_s17, 2  ;;  %v2545_v7 = vld [vmem:[%s3498_s5 + $0x90] ss:$8 sps:$4 sm:$0xff]   ;;  %vm2986_vm2 = vmand %vm1023_vm0, %vm1024_vm1  ;;  %vm1046_vm5 = vsmask.f32 7424 }
  0x23   : > { %2321 = vmatprep.subr.bf16.mxu0 %v2488_v8  ;;  %2385 = vmatprep.subr.bf16.mxu1 %v2488_v8  ;;  %v490_v11 = vld [vmem:[%s2845_s27] sm:$0xff]  ;;  %v491_v12 = vld [vmem:[%s2845_s27 + $0x8] sm:$0xff]  ;;  %s466_s26 = scalar_lea.vmem %s3494_s1, %s2207_s18  ;;  %s3538_s24 = smov (!%p2851_p2, %s472_s24), 15  ;;  %v492_v20 = vld [vmem:[%s2845_s27 + $0x10] sm:$0xff] }
  0x24   : > { %v2217_v13 = vcombine.high %v490_v11, %v491_v12  ;;  %v2499_v16 = vld [vmem:[%s466_s26 + $0x4] ss:$8 sps:$4 sm:$0xff]   ;;  %s3540_s24 = smov (!%p2851_p2, %s3538_s24), 15  ;;  %v493_v21 = vld [vmem:[%s2845_s27 + $0x18] sm:$0xff]  ;;  %v2497_v22 = vld [vmem:[%s466_s26] ss:$8 sps:$4 sm:$0xff]   ;;  %v2216_v24 = vcombine.low %v490_v11, %v491_v12 }
  0x25   : > { %890 = vmatprep.mubr.bf16.mxu1 %v2499_v16  ;;  %s2212_s14 = sshll.u32 %s3540_s24, 2  ;;  %v2219_v25 = vcombine.high %v492_v20, %v493_v21  ;;  %v494_v26 = vld [vmem:[%s2845_s27 + $0x20] sm:$0xff]  ;;  %v495_v27 = vld [vmem:[%s2845_s27 + $0x28] sm:$0xff]  ;;  %v2218_v28 = vcombine.low %v492_v20, %v493_v21  ;;  %v496_v31 = vld [vmem:[%s2845_s27 + $0x30] sm:$0xff]  ;;  %s2678_s26 = smov 64  }
  0x26   : > { %2322 = vmatpush3.bf16.msra.mxu0 %v2489_v9  ;;  %2386 = vmatpush3.bf16.msra.mxu1 %v2489_v9  ;;  %s481_s25 = sadd.s32 %s2212_s14, %s2826_s20  ;;  %v2221_v30 = vcombine.high %v494_v26, %v495_v27  ;;  %v497_v32 = vld [vmem:[%s2845_s27 + $0x38] sm:$0xff]  ;;  %v2220_v33 = vcombine.low %v494_v26, %v495_v27  ;;  %v498_v35 = vld [vmem:[%s2845_s27 + $0x40] sm:$0xff]  ;;  %v499_v36 = vld [vmem:[%s2845_s27 + $0x48] sm:$0xff]  ;;  %s440_s15 = sand.u32 1, %s2652_s10  }
  0x27   : > { %2323 = vmatprep.subr.bf16.mxu0 %v2490_v10  ;;  %2387 = vmatprep.subr.bf16.mxu1 %v2490_v10  ;;  %s2214_s11 = sshll.u32 %s481_s25, 2  ;;  %v2223_v34 = vcombine.high %v496_v31, %v497_v32  ;;  %v2222_v37 = vcombine.low %v496_v31, %v497_v32  ;;  %v2225_v38 = vcombine.high %v498_v35, %v499_v36  ;;  %v500_v39 = vld [vmem:[%s2845_s27 + $0x50] sm:$0xff]  ;;  %v501_v40 = vld [vmem:[%s2845_s27 + $0x58] sm:$0xff]  ;;  %v502_v43 = vld [vmem:[%s2845_s27 + $0x60] sm:$0xff]  ;;  %s2193_s29 = sshll.u32 %s440_s15, 8 }
  0x28   : > { %753 = vmatprep.mubr.bf16.mxu0 %v2217_v13  ;;  %s483_s17 = scalar_lea.vmem %s3495_s2, %s2214_s11  ;;  %v2224_v41 = vcombine.low %v498_v35, %v499_v36  ;;  %v2227_v42 = vcombine.high %v500_v39, %v501_v40  ;;  %v503_v44 = vld [vmem:[%s2845_s27 + $0x68] sm:$0xff]  ;;  %v2226_v45 = vcombine.low %v500_v39, %v501_v40  ;;  %v504_v47 = vld [vmem:[%s2845_s27 + $0x70] sm:$0xff]  ;;  %v505_v48 = vld [vmem:[%s2845_s27 + $0x78] sm:$0xff]  ;;  %s3441_s25 = scalar_lea.sflag [#allocation3], %s440_s15 }
  0x29   : > { %v2513_v23 = vld [vmem:[%s483_s17 + $0x4] ss:$8 sps:$4 sm:$0xff]   ;;  %v2515_v29 = vld [vmem:[%s483_s17] ss:$8 sps:$4 sm:$0xff]   ;;  %v2229_v46 = vcombine.high %v502_v43, %v503_v44  ;;  %v2228_v49 = vcombine.low %v502_v43, %v503_v44  ;;  %v2231_v50 = vcombine.high %v504_v47, %v505_v48  ;;  %v2230_v51 = vcombine.low %v504_v47, %v505_v48  ;;  %v2553_v10 = vld [vmem:[%s3498_s5 + $0xb4] ss:$8 sps:$4 sm:$0xff]  }
  0x2a   : > { %2324 = vmatpush3.bf16.msra.mxu0 %v2491_v14  ;;  %2388 = vmatpush3.bf16.msra.mxu1 %v2491_v14  ;;  %v2550_v8 = vld [vmem:[%s3498_s5 + $0xa4] ss:$8 sps:$4 sm:$0xff]   ;;  %v2548_v9 = vld [vmem:[%s3498_s5 + $0xa0] ss:$8 sps:$4 sm:$0xff]   ;;  %s912_s28 = scalar_select %p911_p4, 1, 0 }
  0x2b   : > { %2325 = vmatprep.subr.bf16.mxu0 %v2492_v15  ;;  %2389 = vmatprep.subr.bf16.mxu1 %v2492_v15  ;;  %v2551_v11 = vld [vmem:[%s3498_s5 + $0xb0] ss:$8 sps:$4 sm:$0xff]   ;;  %v2977_v14 = vld [vmem:[%s3497_s4] ss:$0 sm:$0xff]  ;;  %s915_s20 = scalar_select %p914_p5, 1, 0 }
  0x2c   : > { %s913_s17 = scvt.s32.f32 %s912_s28  ;;  %s2680_s19 = smov [#allocation2]  }
  0x2d   : > { %s916_s24 = scvt.s32.f32 %s915_s20  ;;  %s2312_s20 = sshll.u32 %s2660_s12, 5 }
  0x2e   : > { %2326 = vmatpush3.bf16.msra.mxu0 %v2493_v17  ;;  %2390 = vmatpush3.bf16.msra.mxu1 %v2493_v17  ;;  %v917_v27 = vstv %s913_s17  ;;  %s3353_s17 = scalar_lea.vmem [#allocation2], %s2193_s29 }
  0x2f   : > { %2327 = vmatprep.subr.bf16.mxu0 %v2494_v18  ;;  %2391 = vmatprep.subr.bf16.mxu1 %v2494_v18 }
  0x32   : > { %2328 = vmatpush3.bf16.msra.mxu0 %v2495_v19  ;;  %2392 = vmatpush3.bf16.msra.mxu1 %v2495_v19 }
  0x33   : > { %1443 = vmatprep.subr.bf16.mxu1 %v2520_v53 }
  0x35   : > { %754 = vmatmul.mubr.bf16.vlgmr.msra.gmra.mrb[0].mxu0 %v2216_v24  ;;  %891 = vmatmul.mubr.bf16.vlgmr.msra.gmra.mrb[0].mxu1 %v2497_v22 }
  0x36   : > { %761 = vmatprep.mubr.bf16.mxu0 %v2219_v25  ;;  %898 = vmatprep.mubr.bf16.mxu1 %v2513_v23 }
  0x37   : > { %1444 = vmatpush1.bf16.msra.mxu1 %v2518_v52 }
  0x38   : > { %1445 = vmatprep.subr.bf16.mxu1 %v2523_v54 }
  0x3b   : > { %1446 = vmatpush1.bf16.msra.mxu1 %v2521_v55 }
  0x3c   : > { %1447 = vmatprep.subr.bf16.mxu1 %v2526_v56  ;;  %v920_v56 = vstv %s916_s24  ;;  %s2306_s24 = sshll.u32 %s2664_s13, 6  ;;  %s2055_s13 = sshll.u32 %s3353_s17, 4  ;;  %s3429_s13 = int_to_ptr.vmem [resolvable:$true] %s2055_s13 }
  0x3d   : > { %762 = vmatmul.mubr.bf16.gmra.mrb[4].mxu0 %v2218_v28  ;;  %899 = vmatmul.mubr.bf16.gmra.mrb[4].mxu1 %v2515_v29  ;;  %s2052_s12 = sadd.s32 %s2312_s20, %s2306_s24  ;;  %s2582_s28 = scalar_lea.vmem %s3429_s13, 4096 }
  0x3e   : > { %769 = vmatprep.mubr.bf16.mxu0 %v2221_v30  ;;  %p2583_p6 = scmp.ne.s32.totalorder %s3429_s13, %s2582_s28 }
  0x3f   : > { %1448 = vmatpush1.bf16.msra.mxu1 %v2524_v57 }
  0x40   : > { %1449 = vmatprep.subr.bf16.mxu1 %v2529_v58  ;;  %p2584_p7 = pnand %p2583_p6, %p2784_p3 }
  0x42   : > { %p2585_p9 = pneg %p2584_p7 }
  0x43   : > { %1450 = vmatpush1.bf16.msra.mxu1 %v2527_v59 }
  0x44   : > { %1451 = vmatprep.subr.bf16.mxu1 %v2532_v60 }
  0x45   : > { %770 = vmatmul.mubr.bf16.gmra.mrb[8].mxu0 %v2220_v33 }
  0x46   : > { %777 = vmatprep.mubr.bf16.mxu0 %v2223_v34 }
  0x47   : > { %1452 = vmatpush1.bf16.msra.mxu1 %v2530_v61 }
  0x48   : > { %1453 = vmatprep.subr.bf16.mxu1 %v2535_v62 }
  0x4b   : > { %1454 = vmatpush1.bf16.msra.mxu1 %v2533_v63 }
  0x4c   : > { %1455 = vmatprep.subr.bf16.mxu1 %v2538_v0 }
  0x4d   : > { %778 = vmatmul.mubr.bf16.gmra.mrb[12].mxu0 %v2222_v37 }
  0x4e   : > { %785 = vmatprep.mubr.bf16.mxu0 %v2225_v38 }
  0x4f   : > { %1456 = vmatpush1.bf16.msra.mxu1 %v2536_v1 }
  0x50   : > { %1457 = vmatprep.subr.bf16.mxu1 %v2541_v2 }
  0x53   : > { %1458 = vmatpush1.bf16.msra.mxu1 %v2539_v3 }
  0x54   : > { %1459 = vmatprep.subr.bf16.mxu1 %v2544_v4 }
  0x55   : > { %786 = vmatmul.mubr.bf16.gmra.mrb[16].mxu0 %v2224_v41 }
  0x56   : > { %793 = vmatprep.mubr.bf16.mxu0 %v2227_v42 }
  0x57   : > { %1460 = vmatpush1.bf16.msra.mxu1 %v2542_v5 }
  0x58   : > { %1461 = vmatprep.subr.bf16.mxu1 %v2547_v6 }
  0x5b   : > { %1462 = vmatpush1.bf16.msra.mxu1 %v2545_v7 }
  0x5c   : > { %1463 = vmatprep.subr.bf16.mxu1 %v2550_v8 }
  0x5d   : > { %794 = vmatmul.mubr.bf16.gmra.mrb[20].mxu0 %v2226_v45 }
  0x5e   : > { %801 = vmatprep.mubr.bf16.mxu0 %v2229_v46 }
  0x5f   : > { %1464 = vmatpush1.bf16.msra.mxu1 %v2548_v9 }
  0x60   : > { %1465 = vmatprep.subr.bf16.mxu1 %v2553_v10 }
  0x63   : > { %1466 = vmatpush1.bf16.msra.mxu1 %v2551_v11 }
  0x65   : > { %802 = vmatmul.mubr.bf16.gmra.mrb[24].mxu0 %v2228_v49 }
  0x66   : > { %809 = vmatprep.mubr.bf16.mxu0 %v2231_v50 }
  0x6d   : > { %810 = vmatmul.mubr.bf16.gmra.mrb[28].mxu0 %v2230_v51 }
 0x108   : > { %v2393_v12 = vpop.f32.mrb[0].mxu1  ;;  %v2329_v13 = vpop.f32.mrb[0].mxu0 }
 0x109   : > { %v2394_v15 = vpop.f32.mrb[1].mxu1  ;;  %v2330_v16 = vpop.f32.mrb[1].mxu0 }
 0x10a   : > { %v2395_v17 = vadd.f32 %v2394_v15, %v2393_v12  ;;  %v2396_v18 = vpop.f32.mrb[2].mxu1  ;;  %v2331_v19 = vadd.f32 %v2330_v16, %v2329_v13  ;;  %v2332_v20 = vpop.f32.mrb[2].mxu0 }
 0x10b   : > { %v2397_v21 = vpop.f32.mrb[3].mxu1  ;;  %v2333_v22 = vpop.f32.mrb[3].mxu0 }
 0x10c   : > { %v893_v23 = vadd.f32 %v2395_v17, %v2977_v14  ;;  %v2398_v24 = vadd.f32 %v2397_v21, %v2396_v18  ;;  %v756_v25 = vadd.f32 %v2331_v19, %v2977_v14  ;;  %v2334_v26 = vadd.f32 %v2333_v22, %v2332_v20 }
 0x10e   : > { %v907_v28 = vmax.f32 %v893_v23, 0.0  ;;  %v896_v29 = vadd.f32 %v2398_v24, %v2977_v14  ;;  %v818_v30 = vmax.f32 %v756_v25, 0.0  ;;  %v759_v31 = vadd.f32 %v2334_v26, %v2977_v14 }
 0x110   : > { %v908_v32 = vmax.f32 %v896_v29, 0.0  ;;  %v819_v33 = vmax.f32 %v759_v31, 0.0  ;;  %v2335_v34 = vpop.f32.mrb[4].mxu0  ;;  %v2399_v35 = vpop.f32.mrb[4].mxu1  ;;  %v918_v36 = vmul.f32 %v917_v27, %v907_v28 }
 0x111   : > { %v2336_v37 = vpop.f32.mrb[5].mxu0  ;;  %v2400_v38 = vpop.f32.mrb[5].mxu1 }
 0x112   : > { %v919_v39 = vmul.f32 %v917_v27, %v908_v32  ;;  %v924_v40 = vpack.c.bf16 %v819_v33, %v818_v30  ;;  %v2337_v41 = vadd.f32 %v2336_v37, %v2335_v34  ;;  %v2338_v42 = vpop.f32.mrb[6].mxu0  ;;  %v2401_v43 = vadd.f32 %v2400_v38, %v2399_v35  ;;  %v2402_v44 = vpop.f32.mrb[6].mxu1 }
 0x113   : > { %v2339_v45 = vpop.f32.mrb[7].mxu0  ;;  %v2403_v46 = vpop.f32.mrb[7].mxu1 }
 0x114   : > { %v923_v47 = vpack.c.bf16 %v919_v39, %v918_v36  ;;  %v941_v48 = vshrl.u32 %v924_v40, 16  ;;  %v944_v49 = vshll.u32 %v924_v40, 16  ;;  %v764_v50 = vadd.f32 %v2337_v41, %v2977_v14 }
 0x115   : > { %v2340_v51 = vadd.f32 %v2339_v45, %v2338_v42  ;;  %v901_v52 = vadd.f32 %v2401_v43, %v2977_v14  ;;  %v2404_v53 = vadd.f32 %v2403_v46, %v2402_v44 }
 0x116   : > { %v934_v54 = vshrl.u32 %v923_v47, 16  ;;  %v943_v55 = vrot.slane %v941_v48, 7  ;;  %v820_v58 = vmax.f32 %v764_v50, 0.0  ;;  %v937_v63 = vshll.u32 %v923_v47, 16 }
 0x117   : > { %v767_v59 = vadd.f32 %v2340_v51, %v2977_v14  ;;  %v909_v60 = vmax.f32 %v901_v52, 0.0  ;;  %v904_v61 = vadd.f32 %v2404_v53, %v2977_v14 }
 0x118   : > { %v936_v62 = vrot.slane %v934_v54, 7  ;;  %v946_v0 = vor.u32 %v944_v49, %v943_v55  ;;  %v2341_v1 = vpop.f32.mrb[8].mxu0  ;;  %v2994_v2 = vsel %vm2986_vm2, %v943_v55, 0 }
 0x119   : > { %v821_v3 = vmax.f32 %v767_v59, 0.0  ;;  %v2342_v4 = vpop.f32.mrb[9].mxu0  ;;  %v1067_v5 = vshll.u32 %v2994_v2, 16  ;;  %v921_v15 = vmul.f32 %v920_v56, %v909_v60  ;;  %v910_v16 = vmax.f32 %v904_v61, 0.0 }
 0x11a   : > { %v939_v6 = vor.u32 %v937_v63, %v936_v62  ;;  %v2999_v7 = vsel %vm2986_vm2, 0, %v946_v0  ;;  %v2343_v8 = vadd.f32 %v2342_v4, %v2341_v1  ;;  %v2344_v9 = vpop.f32.mrb[10].mxu0  ;;  %v1036_v10 = vsel %vm2986_vm2, %v936_v62, 0 }
 0x11b   : > { %v925_v11 = vpack.c.bf16 %v821_v3, %v820_v58  ;;  %v2345_v12 = vpop.f32.mrb[11].mxu0  ;;  %v1055_v13 = vshll.u32 %v1036_v10, 16  ;;  %v1062_v20 = vshll.u32 %v2999_v7, 16  ;;  %v1209_v24 = vrot.slane %v1036_v10, 1 }
 0x11c   : > { %v772_v17 = vadd.f32 %v2343_v8, %v2977_v14  ;;  %v2346_v18 = vadd.f32 %v2345_v12, %v2344_v9  ;;  %v3006_v19 = vsel %vm2986_vm2, 0, %v939_v6  ;;  %v1060_v28 = vshrl.u32 %v2999_v7, 16 }
 0x11d   : > { %v948_v21 = vshrl.u32 %v925_v11, 16  ;;  %v951_v22 = vshll.u32 %v925_v11, 16  ;;  %v1208_v23 = vrot.slane %v3006_v19, 1  ;;  %v1050_v27 = vshll.u32 %v3006_v19, 16 }
 0x11e   : > { %v822_v25 = vmax.f32 %v772_v17, 0.0  ;;  %v775_v26 = vadd.f32 %v2346_v18, %v2977_v14  ;;  %v1048_v31 = vshrl.u32 %v3006_v19, 16  ;;  %v1064_v32 = vrot.slane %v1062_v20, 1 }
 0x11f   : > { %v950_v29 = vrot.slane %v948_v21, 7  ;;  %v1210_v30 = vsel %vm1207_vm3, %v1208_v23, %v1209_v24  ;;  %v1052_v35 = vrot.slane %v1050_v27, 1  ;;  %v1057_v36 = vrot.slane %v1055_v13, 1 }
 0x120   : > { %v823_v33 = vmax.f32 %v775_v26, 0.0  ;;  %v2347_v34 = vpop.f32.mrb[12].mxu0  ;;  %2276 = vmatprep.mubr.msk.bf16.mxu1 %vm1238_vm4, %v1210_v30  ;;  %v922_v37 = vmul.f32 %v920_v56, %v910_v16  ;;  %v1069_v40 = vrot.slane %v1067_v5, 1  ;;  %v1211_v42 = vrot.slane %v2999_v7, 1 }
 0x121   : > { %v953_v38 = vor.u32 %v951_v22, %v950_v29  ;;  %v2348_v39 = vpop.f32.mrb[13].mxu0  ;;  %v1038_v41 = vsel %vm2986_vm2, %v950_v29, 0  ;;  %v1053_v46 = vor.u32 %v1052_v35, %v1048_v31  ;;  %v1065_v47 = vor.u32 %v1064_v32, %v1060_v28 }
 0x122   : > { %v926_v43 = vpack.c.bf16 %v823_v33, %v822_v25  ;;  %v2349_v44 = vadd.f32 %v2348_v39, %v2347_v34  ;;  %v2350_v45 = vpop.f32.mrb[14].mxu0  ;;  %v1079_v50 = vshll.u32 %v1038_v41, 16  ;;  %v3023_v51 = vpack.c.bf16 %v922_v37, %v921_v15 }
 0x123   : > { %v2351_v48 = vpop.f32.mrb[15].mxu0  ;;  %v3021_v49 = vsel %vm2986_vm2, 0, %v953_v38  ;;  %v1212_v52 = vrot.slane %v2994_v2, 1  ;;  %v1058_v58 = vsel %vm1046_vm5, %v1053_v46, %v1057_v36  ;;  %v1215_v61 = vrot.slane %v1038_v41, 1 }
 0x124   : > { %v955_v53 = vshrl.u32 %v926_v43, 16  ;;  %v958_v54 = vshll.u32 %v926_v43, 16  ;;  %v780_v55 = vadd.f32 %v2349_v44, %v2977_v14  ;;  %v2352_v56 = vadd.f32 %v2351_v48, %v2350_v45  ;;  %1167 = vrot.lane.b32.xlu0 %v1058_v58, %s2678_s26 }
 0x125   : > { %v1072_v59 = vshrl.u32 %v3021_v49, 16  ;;  %v1074_v60 = vshll.u32 %v3021_v49, 16  ;;  %v1081_v2 = vrot.slane %v1079_v50, 1  ;;  %v3033_v3 = vsel %vm1207_vm3, %v1211_v42, %v1212_v52 }
 0x126   : > { %v957_v62 = vrot.slane %v955_v53, 7  ;;  %v824_v63 = vmax.f32 %v780_v55, 0.0  ;;  %v783_v0 = vadd.f32 %v2352_v56, %v2977_v14  ;;  %v1214_v4 = vrot.slane %v3021_v49, 1 }
 0x127   : > { %v1076_v1 = vrot.slane %v1074_v60, 1  ;;  %v1070_v10 = vsel %vm1046_vm5, %v1065_v47, %v1069_v40 }
 0x128   : > { %v960_v5 = vor.u32 %v958_v54, %v957_v62  ;;  %v825_v6 = vmax.f32 %v783_v0, 0.0  ;;  %v2353_v8 = vpop.f32.mrb[16].mxu0  ;;  %v1039_v9 = vsel %vm2986_vm2, %v957_v62, 0  ;;  %v3040_v15 = vsel %vm1207_vm3, %v1214_v4, %v1215_v61  ;;  %1169 = vrot.lane.b32.xlu0 %v1070_v10, %s2678_s26 }
 0x129   : > { %v2354_v11 = vpop.f32.mrb[17].mxu0  ;;  %v1077_v12 = vor.u32 %v1076_v1, %v1072_v59  ;;  %v1091_v13 = vshll.u32 %v1039_v9, 16  ;;  %v1218_v25 = vrot.slane %v1039_v9, 1  ;;  %v997_v4 = vshrl.u32 %v3023_v51, 16 }
 0x12a   : > { %v3044_v16 = vsel %vm2986_vm2, 0, %v960_v5  ;;  %v927_v17 = vpack.c.bf16 %v825_v6, %v824_v63  ;;  %v2355_v18 = vadd.f32 %v2354_v11, %v2353_v8  ;;  %v2356_v20 = vpop.f32.mrb[18].mxu0 }
 0x12b   : > { %v1082_v21 = vsel %vm1046_vm5, %v1077_v12, %v1081_v2  ;;  %v2357_v22 = vpop.f32.mrb[19].mxu0  ;;  %v1084_v23 = vshrl.u32 %v3044_v16, 16  ;;  %v1086_v24 = vshll.u32 %v3044_v16, 16  ;;  %v1093_v31 = vrot.slane %v1091_v13, 1 }
 0x12c   : > { %v962_v26 = vshrl.u32 %v927_v17, 16  ;;  %v965_v27 = vshll.u32 %v927_v17, 16  ;;  %v788_v28 = vadd.f32 %v2355_v18, %v2977_v14  ;;  %1171 = vrot.lane.b32.xlu1 %v1082_v21, %s2678_s26  ;;  %v2358_v29 = vadd.f32 %v2357_v22, %v2356_v20 }
 0x12d   : > { %v1088_v30 = vrot.slane %v1086_v24, 1  ;;  %v1217_v32 = vrot.slane %v3044_v16, 1 }
 0x12e   : > { %v964_v33 = vrot.slane %v962_v26, 7  ;;  %v826_v34 = vmax.f32 %v788_v28, 0.0  ;;  %v791_v35 = vadd.f32 %v2358_v29, %v2977_v14 }
 0x12f   : > { %v1089_v36 = vor.u32 %v1088_v30, %v1084_v23  ;;  %v3055_v37 = vsel %vm1207_vm3, %v1217_v32, %v1218_v25  ;;  %v1000_v23 = vshll.u32 %v3023_v51, 16  ;;  %v999_v25 = vrot.slane %v997_v4, 7 }
 0x130   : > { %v967_v38 = vor.u32 %v965_v27, %v964_v33  ;;  %v827_v39 = vmax.f32 %v791_v35, 0.0  ;;  %v2359_v40 = vpop.f32.mrb[20].mxu0  ;;  %v1040_v41 = vsel %vm2986_vm2, %v964_v33, 0 }
 0x131   : > { %v2360_v42 = vpop.f32.mrb[21].mxu0  ;;  %v1094_v43 = vsel %vm1046_vm5, %v1089_v36, %v1093_v31  ;;  %v1103_v44 = vshll.u32 %v1040_v41, 16  ;;  %v1221_v54 = vrot.slane %v1040_v41, 1 }
 0x132   : > { %v3062_v45 = vsel %vm2986_vm2, 0, %v967_v38  ;;  %v928_v46 = vpack.c.bf16 %v827_v39, %v826_v34  ;;  %v2361_v47 = vadd.f32 %v2360_v42, %v2359_v40  ;;  %v2362_v48 = vpop.f32.mrb[22].mxu0  ;;  %1173 = vrot.lane.b32.xlu1 %v1094_v43, %s2678_s26  ;;  %v1002_v39 = vor.u32 %v1000_v23, %v999_v25 }
 0x133   : > { %v2363_v50 = vpop.f32.mrb[23].mxu0  ;;  %v1096_v52 = vshrl.u32 %v3062_v45, 16  ;;  %v1098_v53 = vshll.u32 %v3062_v45, 16  ;;  %v1105_v61 = vrot.slane %v1103_v44, 1  ;;  %v1220_v62 = vrot.slane %v3062_v45, 1 }
 0x134   : > { %v969_v55 = vshrl.u32 %v928_v46, 16  ;;  %v972_v56 = vshll.u32 %v928_v46, 16  ;;  %v796_v58 = vadd.f32 %v2361_v47, %v2977_v14  ;;  %v2364_v59 = vadd.f32 %v2363_v50, %v2362_v48 }
 0x135   : > { %v1100_v60 = vrot.slane %v1098_v53, 1  ;;  %v3072_v5 = vsel %vm1207_vm3, %v1220_v62, %v1221_v54 }
 0x136   : > { %v971_v63 = vrot.slane %v969_v55, 7  ;;  %v828_v0 = vmax.f32 %v796_v58, 0.0  ;;  %v799_v1 = vadd.f32 %v2364_v59, %v2977_v14 }
 0x137   : > { %v1101_v2 = vor.u32 %v1100_v60, %v1096_v52  ;;  %v3103_v60 = vsel %vm2986_vm2, 0, %v1002_v39 }
 0x138   : > { %v974_v6 = vor.u32 %v972_v56, %v971_v63  ;;  %v829_v8 = vmax.f32 %v799_v1, 0.0  ;;  %v2365_v9 = vpop.f32.mrb[24].mxu0  ;;  %v1041_v10 = vsel %vm2986_vm2, %v971_v63, 0 }
 0x139   : > { %v2366_v11 = vpop.f32.mrb[25].mxu0  ;;  %v1106_v12 = vsel %vm1046_vm5, %v1101_v2, %v1105_v61  ;;  %v1115_v13 = vshll.u32 %v1041_v10, 16  ;;  %v1224_v17 = vrot.slane %v1041_v10, 1 }
 0x13a   : > { %v3079_v18 = vsel %vm2986_vm2, 0, %v974_v6  ;;  %v929_v20 = vpack.c.bf16 %v829_v8, %v828_v0  ;;  %v2367_v21 = vadd.f32 %v2366_v11, %v2365_v9  ;;  %v2368_v22 = vpop.f32.mrb[26].mxu0  ;;  %1175 = vrot.lane.b32.xlu0 %v1106_v12, %s2678_s26  ;;  %v1045_v12 = vsel %vm2986_vm2, %v999_v25, 0 }
 0x13b   : > { %v2369_v24 = vpop.f32.mrb[27].mxu0  ;;  %v1108_v26 = vshrl.u32 %v3079_v18, 16  ;;  %v1110_v27 = vshll.u32 %v3079_v18, 16  ;;  %v1223_v28 = vrot.slane %v3079_v18, 1  ;;  %v1117_v34 = vrot.slane %v1115_v13, 1 }
 0x13c   : > { %v976_v29 = vshrl.u32 %v929_v20, 16  ;;  %v979_v30 = vshll.u32 %v929_v20, 16  ;;  %v804_v31 = vadd.f32 %v2367_v21, %v2977_v14  ;;  %v2370_v32 = vadd.f32 %v2369_v24, %v2368_v22 }
 0x13d   : > { %v1112_v33 = vrot.slane %v1110_v27, 1  ;;  %v3088_v35 = vsel %vm1207_vm3, %v1223_v28, %v1224_v17  ;;  %v1158_v13 = vshll.u32 %v3103_v60, 16  ;;  %v1156_v25 = vshrl.u32 %v3103_v60, 16 }
 0x13e   : > { %v978_v36 = vrot.slane %v976_v29, 7  ;;  %v830_v51 = vmax.f32 %v804_v31, 0.0  ;;  %v807_v38 = vadd.f32 %v2370_v32, %v2977_v14  ;;  %v1163_v27 = vshll.u32 %v1045_v12, 16 }
 0x13f   : > { %v1113_v40 = vor.u32 %v1112_v33, %v1108_v26 }
 0x140   : > { %v981_v41 = vor.u32 %v979_v30, %v978_v36  ;;  %v831_v42 = vmax.f32 %v807_v38, 0.0  ;;  %v2371_v43 = vpop.f32.mrb[28].mxu0  ;;  %v1042_v44 = vsel %vm2986_vm2, %v978_v36, 0  ;;  %v1160_v30 = vrot.slane %v1158_v13, 1  ;;  %v2556_v13 = vld [vmem:[%s3500_s7 + $0x4] ss:$8 sps:$4 sm:$0xff]  }
 0x141   : > { %v2372_v46 = vpop.f32.mrb[29].mxu0  ;;  %v1118_v47 = vsel %vm1046_vm5, %v1113_v40, %v1117_v34  ;;  %v1127_v48 = vshll.u32 %v1042_v44, 16  ;;  %v1227_v50 = vrot.slane %v1042_v44, 1  ;;  %1797 = vmatprep.subr.bf16.mxu0 %v2556_v13 }
 0x142   : > { %v3096_v52 = vsel %vm2986_vm2, 0, %v981_v41  ;;  %v930_v53 = vpack.c.bf16 %v831_v42, %v830_v51  ;;  %v2373_v54 = vadd.f32 %v2372_v46, %v2371_v43  ;;  %v2374_v55 = vpop.f32.mrb[30].mxu0  ;;  %1177 = vrot.lane.b32.xlu1 %v1118_v47, %s2678_s26  ;;  %v1161_v40 = vor.u32 %v1160_v30, %v1156_v25 }
 0x143   : > { %v2375_v56 = vpop.f32.mrb[31].mxu0  ;;  %v1120_v58 = vshrl.u32 %v3096_v52, 16  ;;  %v1122_v59 = vshll.u32 %v3096_v52, 16  ;;  %v1226_v61 = vrot.slane %v3096_v52, 1  ;;  %v1129_v4 = vrot.slane %v1127_v48, 1 }
 0x144   : > { %v983_v62 = vshrl.u32 %v930_v53, 16  ;;  %v986_v63 = vshll.u32 %v930_v53, 16  ;;  %v812_v0 = vadd.f32 %v2373_v54, %v2977_v14  ;;  %v2376_v1 = vadd.f32 %v2375_v56, %v2374_v55 }
 0x145   : > { %v1124_v2 = vrot.slane %v1122_v59, 1  ;;  %v3108_v6 = vsel %vm1207_vm3, %v1226_v61, %v1227_v50  ;;  %v1165_v41 = vrot.slane %v1163_v27, 1  ;;  %v1235_v48 = vrot.slane %v3103_v60, 1 }
 0x146   : > { %v985_v8 = vrot.slane %v983_v62, 7  ;;  %v832_v9 = vmax.f32 %v812_v0, 0.0  ;;  %v815_v10 = vadd.f32 %v2376_v1, %v2977_v14  ;;  %v1236_v53 = vrot.slane %v1045_v12, 1  ;;  %v2554_v12 = vld [vmem:[%s3500_s7] ss:$8 sps:$4 sm:$0xff]  }
 0x147   : > { %v1125_v11 = vor.u32 %v1124_v2, %v1120_v58  ;;  %v1166_v54 = vsel %vm1046_vm5, %v1161_v40, %v1165_v41  ;;  %1798 = vmatpush1.bf16.msra.mxu0 %v2554_v12  ;;  %v2679_v30 = vmov 0  }
 0x148   : > { %v988_v17 = vor.u32 %v986_v63, %v985_v8  ;;  %v833_v20 = vmax.f32 %v815_v10, 0.0  ;;  %v1043_v21 = vsel %vm2986_vm2, %v985_v8, 0  ;;  %v1237_v59 = vsel %vm1207_vm3, %v1235_v48, %v1236_v53  ;;  %1829 = vmatprep.mubr.bf16.mxu0 %v2679_v30 }
 0x149   : > { %v1130_v22 = vsel %vm1046_vm5, %v1125_v11, %v1129_v4  ;;  %v1139_v23 = vshll.u32 %v1043_v21, 16  ;;  %v1230_v24 = vrot.slane %v1043_v21, 1  ;;  %v2560_v21 = vld [vmem:[%s3500_s7 + $0x20] ss:$8 sps:$4 sm:$0xff]  }
 0x14a   : > { %v3119_v26 = vsel %vm2986_vm2, 0, %v988_v17  ;;  %v931_v14 = vpack.c.bf16 %v833_v20, %v832_v9  ;;  %1179 = vrot.lane.b32.xlu0 %v1130_v22, %s2678_s26  ;;  %v2557_v17 = vld [vmem:[%s3500_s7 + $0x10] ss:$8 sps:$4 sm:$0xff]   ;;  %v2559_v20 = vld [vmem:[%s3500_s7 + $0x14] ss:$8 sps:$4 sm:$0xff]  }
 0x14b   : > { %v1132_v28 = vshrl.u32 %v3119_v26, 16  ;;  %v1134_v29 = vshll.u32 %v3119_v26, 16  ;;  %v1229_v31 = vrot.slane %v3119_v26, 1  ;;  %v1141_v36 = vrot.slane %v1139_v23, 1  ;;  %1799 = vmatprep.subr.bf16.mxu0 %v2559_v20  ;;  %v2565_v22 = vld [vmem:[%s3500_s7 + $0x34] ss:$8 sps:$4 sm:$0xff]  }
 0x14c   : > { %v990_v32 = vshrl.u32 %v931_v14, 16  ;;  %v993_v33 = vshll.u32 %v931_v14, 16  ;;  %1800 = vmatpush1.bf16.msra.mxu0 %v2557_v17  ;;  %v2563_v23 = vld [vmem:[%s3500_s7 + $0x30] ss:$8 sps:$4 sm:$0xff]  }
 0x14d   : > { %v1136_v34 = vrot.slane %v1134_v29, 1  ;;  %v1231_v51 = vsel %vm1207_vm3, %v1229_v31, %v1230_v24 }
 0x14e   : > { %v992_v38 = vrot.slane %v990_v32, 7 }
 0x14f   : > { %v1137_v39 = vor.u32 %v1136_v34, %v1132_v28 }
 0x150   : > { %v995_v42 = vor.u32 %v993_v33, %v992_v38  ;;  %v1044_v43 = vsel %vm2986_vm2, %v992_v38, 0 }
 0x151   : > { %v1142_v44 = vsel %vm1046_vm5, %v1137_v39, %v1141_v36  ;;  %v1151_v46 = vshll.u32 %v1044_v43, 16  ;;  %v1233_v47 = vrot.slane %v1044_v43, 1 }
 0x152   : > { %v1034_v50 = vsel %vm2986_vm2, 0, %v995_v42  ;;  %1181 = vrot.lane.b32.xlu1 %v1142_v44, %s2678_s26 }
 0x153   : > { %v1144_v55 = vshrl.u32 %v1034_v50, 16  ;;  %v1146_v56 = vshll.u32 %v1034_v50, 16  ;;  %v1232_v58 = vrot.slane %v1034_v50, 1  ;;  %v1153_v62 = vrot.slane %v1151_v46, 1 }
 0x155   : > { %v1148_v61 = vrot.slane %v1146_v56, 1  ;;  %v1234_v63 = vsel %vm1207_vm3, %v1232_v58, %v1233_v47 }
 0x156   : > { %1185 = vrot.lane.b32.xlu1 %v1166_v54, %s2678_s26 }
 0x157   : > { %v1149_v0 = vor.u32 %v1148_v61, %v1144_v55 }
 0x159   : > { %v1154_v57 = vsel %vm1046_vm5, %v1149_v0, %v1153_v62 }
 0x15a   : > { %1183 = vrot.lane.b32.xlu0 %v1154_v57, %s2678_s26 }
 0x196   : > { %v1168_v1 = vpop.permute.xlu0 %1167 }
 0x197   : > { %v1240_v2 = vsel %vm1238_vm4, %v3006_v19, %v1168_v1 }
 0x198   : > { %1476 = vmatmul.mubr.bf16.vlgmr.msra.gmra.mrb[8].mxu1 %v1240_v2 }
 0x199   : > { %2277 = vmatprep.mubr.msk.bf16.mxu1 %vm1238_vm4, %v3033_v3 }
 0x19a   : > { %v1170_v4 = vpop.permute.xlu0 %1169 }
 0x19b   : > { %v1243_v8 = vsel %vm1238_vm4, %v2999_v7, %v1170_v4 }
 0x19e   : > { %v1172_v9 = vpop.permute.xlu1 %1171 }
 0x19f   : > { %v1246_v10 = vsel %vm1238_vm4, %v3021_v49, %v1172_v9 }
 0x1a0   : > { %1484 = vmatmul.mubr.bf16.gmra.mrb[12].mxu1 %v1243_v8 }
 0x1a1   : > { %2278 = vmatprep.mubr.msk.bf16.mxu1 %vm1238_vm4, %v3040_v15 }
 0x1a4   : > { %v1174_v19 = vpop.permute.xlu1 %1173 }
 0x1a5   : > { %v1249_v3 = vsel %vm1238_vm4, %v3044_v16, %v1174_v19 }
 0x1a8   : > { %1492 = vmatmul.mubr.bf16.gmra.mrb[16].mxu1 %v1246_v10 }
 0x1a9   : > { %2279 = vmatprep.mubr.msk.bf16.mxu1 %vm1238_vm4, %v3055_v37 }
 0x1ac   : > { %v1176_v7 = vpop.permute.xlu0 %1175 }
 0x1ad   : > { %v1252_v15 = vsel %vm1238_vm4, %v3062_v45, %v1176_v7 }
 0x1b0   : > { %1502 = vmatmul.mubr.bf16.gmra.mrb[20].mxu1 %v1249_v3  ;;  %v3280_v3 = vld [vmem:[%s3499_s6] ss:$0 sm:$0xff] }
 0x1b1   : > { %2280 = vmatprep.mubr.msk.bf16.mxu1 %vm1238_vm4, %v3072_v5 }
 0x1b4   : > { %v1178_v49 = vpop.permute.xlu1 %1177 }
 0x1b5   : > { %v1255_v37 = vsel %vm1238_vm4, %v3079_v18, %v1178_v49 }
 0x1b8   : > { %1512 = vmatmul.mubr.bf16.gmra.mrb[24].mxu1 %v1252_v15 }
 0x1b9   : > { %2281 = vmatprep.mubr.msk.bf16.mxu1 %vm1238_vm4, %v3088_v35 }
 0x1bc   : > { %v1180_v16 = vpop.permute.xlu0 %1179 }
 0x1bd   : > { %v1258_v5 = vsel %vm1238_vm4, %v3096_v52, %v1180_v16 }
 0x1c0   : > { %1522 = vmatmul.mubr.bf16.gmra.mrb[28].mxu1 %v1255_v37 }
 0x1c1   : > { %2282 = vmatprep.mubr.msk.bf16.mxu1 %vm1238_vm4, %v3108_v6 }
 0x1c4   : > { %v1182_v45 = vpop.permute.xlu1 %1181 }
 0x1c5   : > { %v1261_v11 = vsel %vm1238_vm4, %v3119_v26, %v1182_v45 }
 0x1c8   : > { %1532 = vmatmul.mubr.bf16.gmra.mrb[32].mxu1 %v1258_v5  ;;  %v1186_v6 = vpop.permute.xlu1 %1185 }
 0x1c9   : > { %2283 = vmatprep.mubr.msk.bf16.mxu1 %vm1238_vm4, %v1231_v51  ;;  %v1267_v52 = vsel %vm1238_vm4, %v3103_v60, %v1186_v6  ;;  %v2562_v60 = vld [vmem:[%s3500_s7 + $0x24] ss:$8 sps:$4 sm:$0xff]  }
 0x1ca   : > { %1801 = vmatprep.subr.bf16.mxu0 %v2562_v60 }
 0x1cb   : > { %1802 = vmatpush1.bf16.msra.mxu0 %v2560_v21 }
 0x1cc   : > { %v1184_v35 = vpop.permute.xlu0 %1183  ;;  %1803 = vmatprep.subr.bf16.mxu0 %v2565_v22 }
 0x1cd   : > { %v1264_v18 = vsel %vm1238_vm4, %v1034_v50, %v1184_v35 }
 0x1cf   : > { %1804 = vmatpush1.bf16.msra.mxu0 %v2563_v23 }
 0x1d0   : > { %1542 = vmatmul.mubr.bf16.gmra.mrb[36].mxu1 %v1261_v11 }
 0x1d1   : > { %2284 = vmatprep.mubr.msk.bf16.mxu1 %vm1238_vm4, %v1234_v63 }
 0x1d8   : > { %1552 = vmatmul.mubr.bf16.gmra.mrb[40].mxu1 %v1264_v18 }
 0x1d9   : > { %2285 = vmatprep.mubr.msk.bf16.mxu1 %vm1238_vm4, %v1237_v59 }
 0x1e0   : > { %1562 = vmatmul.mubr.bf16.gmra.mrb[44].mxu1 %v1267_v52 }
 0x26b   : > { %v1477_v24 = vpop.f32.mrb[8].mxu1 }
 0x26c   : > { %v1479_v26 = vpop.f32.mrb[9].mxu1 }
 0x26d   : > { %v1480_v14 = vpop.f32.mrb[10].mxu1 }
 0x26e   : > { %v1482_v25 = vpop.f32.mrb[11].mxu1 }
 0x273   : > { %v3198_v27 = vpop.f32.mrb[12].mxu1 }
 0x274   : > { %1586 = vrot.lane.b32.xlu0 %v3198_v27, %s2678_s26  ;;  %v1487_v28 = vpop.f32.mrb[13].mxu1 }
 0x275   : > { %v3202_v29 = vpop.f32.mrb[14].mxu1 }
 0x276   : > { %1588 = vrot.lane.b32.xlu1 %v3202_v29, %s2678_s26  ;;  %v1490_v31 = vpop.f32.mrb[15].mxu1 }
 0x27b   : > { %v3207_v32 = vpop.f32.mrb[16].mxu1 }
 0x27c   : > { %1590 = vrot.lane.b32.xlu0 %v3207_v32, %s2678_s26  ;;  %v1495_v33 = vpop.f32.mrb[17].mxu1 }
 0x27d   : > { %v3211_v34 = vpop.f32.mrb[18].mxu1 }
 0x27e   : > { %1592 = vrot.lane.b32.xlu1 %v3211_v34, %s2678_s26  ;;  %v1499_v36 = vpop.f32.mrb[19].mxu1 }
 0x283   : > { %v3215_v51 = vpop.f32.mrb[20].mxu1 }
 0x284   : > { %1594 = vrot.lane.b32.xlu0 %v3215_v51, %s2678_s26  ;;  %v1505_v38 = vpop.f32.mrb[21].mxu1 }
 0x285   : > { %v3219_v39 = vpop.f32.mrb[22].mxu1 }
 0x286   : > { %1596 = vrot.lane.b32.xlu1 %v3219_v39, %s2678_s26  ;;  %v1509_v40 = vpop.f32.mrb[23].mxu1 }
 0x28b   : > { %v3223_v41 = vpop.f32.mrb[24].mxu1 }
 0x28c   : > { %1598 = vrot.lane.b32.xlu0 %v3223_v41, %s2678_s26  ;;  %v1515_v42 = vpop.f32.mrb[25].mxu1 }
 0x28d   : > { %v3227_v43 = vpop.f32.mrb[26].mxu1 }
 0x28e   : > { %1600 = vrot.lane.b32.xlu1 %v3227_v43, %s2678_s26  ;;  %v1519_v44 = vpop.f32.mrb[27].mxu1 }
 0x293   : > { %v3231_v46 = vpop.f32.mrb[28].mxu1 }
 0x294   : > { %1602 = vrot.lane.b32.xlu0 %v3231_v46, %s2678_s26  ;;  %v3235_v47 = vpop.f32.mrb[29].mxu1 }
 0x295   : > { %v3237_v48 = vpop.f32.mrb[30].mxu1 }
 0x296   : > { %1604 = vrot.lane.b32.xlu1 %v3237_v48, %s2678_s26  ;;  %v3241_v50 = vpop.f32.mrb[31].mxu1 }
 0x29b   : > { %v3243_v53 = vpop.f32.mrb[32].mxu1 }
 0x29c   : > { %1606 = vrot.lane.b32.xlu0 %v3243_v53, %s2678_s26  ;;  %v3247_v54 = vpop.f32.mrb[33].mxu1 }
 0x29d   : > { %v3249_v55 = vpop.f32.mrb[34].mxu1 }
 0x29e   : > { %1608 = vrot.lane.b32.xlu1 %v3249_v55, %s2678_s26  ;;  %v3253_v56 = vpop.f32.mrb[35].mxu1 }
 0x2a3   : > { %v3255_v58 = vpop.f32.mrb[36].mxu1 }
 0x2a4   : > { %1610 = vrot.lane.b32.xlu0 %v3255_v58, %s2678_s26  ;;  %v3259_v59 = vpop.f32.mrb[37].mxu1 }
 0x2a5   : > { %v3261_v61 = vpop.f32.mrb[38].mxu1 }
 0x2a6   : > { %1612 = vrot.lane.b32.xlu1 %v3261_v61, %s2678_s26  ;;  %v3265_v62 = vpop.f32.mrb[39].mxu1 }
 0x2ab   : > { %v1553_v63 = vpop.f32.mrb[40].mxu1 }
 0x2ac   : > { %1614 = vrot.lane.b32.xlu0 %v1553_v63, %s2678_s26  ;;  %v3268_v0 = vpop.f32.mrb[41].mxu1 }
 0x2ad   : > { %v1557_v57 = vpop.f32.mrb[42].mxu1 }
 0x2ae   : > { %1616 = vrot.lane.b32.xlu1 %v1557_v57, %s2678_s26  ;;  %v3271_v1 = vpop.f32.mrb[43].mxu1  ;;  %s2586_s26 = sshll.u32 %s2680_s19, 4  ;;  %s2587_s26 = int_to_ptr.vmem [resolvable:$false] %s2586_s26 }
 0x2af   : > { %s2588_s11 = scalar_lea.vmem %s2587_s26, 8192  ;;  %p2589_p10 = scmp.lt.s32.totalorder %s3429_s13, %s2587_s26 }
 0x2b0   : > { %p2590_p11 = scmp.lt.s32.totalorder %s2588_s11, %s2582_s28 }
 0x2b2   : > { %p2591_p12 = por %p2590_p11, %p2589_p10 }
 0x2b3   : > { %v1563_v2 = vpop.f32.mrb[44].mxu1 }
 0x2b4   : > { %v3273_v4 = vpop.f32.mrb[45].mxu1  ;;  %p2592_p13 = pnand %p2591_p12, %p2585_p9 }
 0x2b5   : > { %v1566_v8 = vpop.f32.mrb[46].mxu1 }
 0x2b6   : > { %v3275_v9 = vpop.f32.mrb[47].mxu1 }
 0x2e6   : > { %v1587_v10 = vpop.permute.xlu0 %1586 }
 0x2e7   : > { %v1634_v19 = vadd.f32 %v1587_v10, %v1477_v24 }
 0x2e8   : > { %v1589_v7 = vpop.permute.xlu1 %1588 }
 0x2e9   : > { %v1650_v15 = vadd.f32 %v1634_v19, %v1495_v33  ;;  %v1635_v49 = vadd.f32 %v1589_v7, %v1480_v14 }
 0x2eb   : > { %v1673_v37 = vadd.f32 %v3280_v3, %v1650_v15  ;;  %v1651_v16 = vadd.f32 %v1635_v49, %v1499_v36 }
 0x2ed   : > { %v1674_v5 = vadd.f32 %v3280_v3, %v1651_v16  ;;  %v1689_v11 = vmax.f32 %v1673_v37, 0.0 }
 0x2ee   : > { %v1591_v45 = vpop.permute.xlu0 %1590 }
 0x2ef   : > { %v1690_v35 = vmax.f32 %v1674_v5, 0.0  ;;  %v1636_v18 = vadd.f32 %v1591_v45, %v3198_v27 }
 0x2f0   : > { %v1593_v6 = vpop.permute.xlu1 %1592 }
 0x2f1   : > { %v1705_v52 = vpack.c.bf16 %v1690_v35, %v1689_v11  ;;  %v1652_v12 = vadd.f32 %v1636_v18, %v1505_v38  ;;  %v1637_v13 = vadd.f32 %v1593_v6, %v3202_v29 }
 0x2f3   : > { %v1675_v17 = vadd.f32 %v3280_v3, %v1652_v12  ;;  %v1653_v20 = vadd.f32 %v1637_v13, %v1509_v40  ;;  %2295 = vmatmul.mubr.msk.bf16.vlgmr.msra.gmra.mrb[32].mxu0 %vm1238_vm4, %v1705_v52 }
 0x2f4   : > { %1839 = vmatprep.mubr.bf16.mxu0 %v2679_v30 }
 0x2f5   : > { %v1676_v60 = vadd.f32 %v3280_v3, %v1653_v20  ;;  %v1691_v22 = vmax.f32 %v1675_v17, 0.0 }
 0x2f6   : > { %v1595_v21 = vpop.permute.xlu0 %1594 }
 0x2f7   : > { %v1692_v23 = vmax.f32 %v1676_v60, 0.0  ;;  %v1638_v24 = vadd.f32 %v1595_v21, %v3207_v32 }
 0x2f8   : > { %v1597_v26 = vpop.permute.xlu1 %1596 }
 0x2f9   : > { %v1706_v14 = vpack.c.bf16 %v1692_v23, %v1691_v22  ;;  %v1654_v25 = vadd.f32 %v1638_v24, %v1515_v42  ;;  %v1639_v27 = vadd.f32 %v1597_v26, %v3211_v34 }
 0x2fb   : > { %v1677_v28 = vadd.f32 %v3280_v3, %v1654_v25  ;;  %v1655_v29 = vadd.f32 %v1639_v27, %v1519_v44  ;;  %2296 = vmatmul.mubr.msk.bf16.gmra.mrb[36].mxu0 %vm1238_vm4, %v1706_v14 }
 0x2fc   : > { %1849 = vmatprep.mubr.bf16.mxu0 %v2679_v30 }
 0x2fd   : > { %v1678_v31 = vadd.f32 %v3280_v3, %v1655_v29  ;;  %v1693_v36 = vmax.f32 %v1677_v28, 0.0 }
 0x2fe   : > { %v1599_v33 = vpop.permute.xlu0 %1598 }
 0x2ff   : > { %v1694_v38 = vmax.f32 %v1678_v31, 0.0  ;;  %v1640_v40 = vadd.f32 %v1599_v33, %v3215_v51 }
 0x300   : > { %v1601_v32 = vpop.permute.xlu1 %1600 }
 0x301   : > { %v1707_v63 = vpack.c.bf16 %v1694_v38, %v1693_v36  ;;  %v1656_v42 = vadd.f32 %v1640_v40, %v3235_v47  ;;  %v1641_v34 = vadd.f32 %v1601_v32, %v3219_v39 }
 0x303   : > { %v1679_v57 = vadd.f32 %v3280_v3, %v1656_v42  ;;  %v1657_v44 = vadd.f32 %v1641_v34, %v3241_v50  ;;  %2297 = vmatmul.mubr.msk.bf16.gmra.mrb[40].mxu0 %vm1238_vm4, %v1707_v63  ;;  %v2567_v34 = vld [vmem:[%s2845_s27 + $0x8] sm:$0xff] }
 0x304   : > { %1859 = vmatprep.mubr.bf16.mxu0 %v2679_v30 }
 0x305   : > { %v1680_v2 = vadd.f32 %v3280_v3, %v1657_v44  ;;  %v1695_v10 = vmax.f32 %v1679_v57, 0.0  ;;  %v1912_v57 = vunpack.c.l.bf16 %v2567_v34 }
 0x306   : > { %v1603_v8 = vpop.permute.xlu0 %1602 }
 0x307   : > { %v1696_v19 = vmax.f32 %v1680_v2, 0.0  ;;  %v1642_v51 = vadd.f32 %v1603_v8, %v3223_v41  ;;  %v1913_v8 = vunpack.c.h.bf16 %v2567_v34 }
 0x308   : > { %v1605_v7 = vpop.permute.xlu1 %1604 }
 0x309   : > { %v1708_v15 = vpack.c.bf16 %v1696_v19, %v1695_v10  ;;  %v1658_v47 = vadd.f32 %v1642_v51, %v3247_v54  ;;  %v1643_v39 = vadd.f32 %v1605_v7, %v3227_v43 }
 0x30b   : > { %v1681_v49 = vadd.f32 %v3280_v3, %v1658_v47  ;;  %v1659_v50 = vadd.f32 %v1643_v39, %v3253_v56  ;;  %2298 = vmatmul.mubr.msk.bf16.gmra.mrb[44].mxu0 %vm1238_vm4, %v1708_v15 }
 0x30c   : > { %1869 = vmatprep.mubr.bf16.mxu0 %v2679_v30 }
 0x30d   : > { %v1682_v37 = vadd.f32 %v3280_v3, %v1659_v50  ;;  %v1697_v5 = vmax.f32 %v1681_v49, 0.0 }
 0x30e   : > { %v1607_v16 = vpop.permute.xlu0 %1606 }
 0x30f   : > { %v1698_v45 = vmax.f32 %v1682_v37, 0.0  ;;  %v1644_v41 = vadd.f32 %v1607_v16, %v3231_v46  ;;  %v2568_v16 = vld [vmem:[%s2845_s27 + $0x10] sm:$0xff] }
 0x310   : > { %v1609_v11 = vpop.permute.xlu1 %1608 }
 0x311   : > { %v1709_v35 = vpack.c.bf16 %v1698_v45, %v1697_v5  ;;  %v1660_v54 = vadd.f32 %v1644_v41, %v3259_v59  ;;  %v1645_v43 = vadd.f32 %v1609_v11, %v3237_v48  ;;  %v1914_v5 = vunpack.c.l.bf16 %v2568_v16 }
 0x312   : > { %v1915_v11 = vunpack.c.h.bf16 %v2568_v16 }
 0x313   : > { %v1683_v18 = vadd.f32 %v3280_v3, %v1660_v54  ;;  %v1661_v56 = vadd.f32 %v1645_v43, %v3265_v62  ;;  %2299 = vmatmul.mubr.msk.bf16.gmra.mrb[48].mxu0 %vm1238_vm4, %v1709_v35  ;;  %v2569_v43 = vld [vmem:[%s2845_s27 + $0x18] sm:$0xff] }
 0x314   : > { %1879 = vmatprep.mubr.bf16.mxu0 %v2679_v30 }
 0x315   : > { %v1684_v6 = vadd.f32 %v3280_v3, %v1661_v56  ;;  %v1699_v12 = vmax.f32 %v1683_v18, 0.0  ;;  %v1916_v18 = vunpack.c.l.bf16 %v2569_v43 }
 0x316   : > { %v1611_v52 = vpop.permute.xlu0 %1610 }
 0x317   : > { %v1700_v13 = vmax.f32 %v1684_v6, 0.0  ;;  %v1646_v46 = vadd.f32 %v1611_v52, %v3243_v53  ;;  %v1917_v52 = vunpack.c.h.bf16 %v2569_v43 }
 0x318   : > { %v1613_v17 = vpop.permute.xlu1 %1612 }
 0x319   : > { %v1710_v20 = vpack.c.bf16 %v1700_v13, %v1699_v12  ;;  %v1662_v59 = vadd.f32 %v1646_v46, %v3268_v0  ;;  %v1647_v48 = vadd.f32 %v1613_v17, %v3249_v55 }
 0x31b   : > { %v1685_v60 = vadd.f32 %v3280_v3, %v1662_v59  ;;  %v1663_v62 = vadd.f32 %v1647_v48, %v3271_v1  ;;  %2300 = vmatmul.mubr.msk.bf16.gmra.mrb[52].mxu0 %vm1238_vm4, %v1710_v20 }
 0x31c   : > { %1889 = vmatprep.mubr.bf16.mxu0 %v2679_v30 }
 0x31d   : > { %v1686_v21 = vadd.f32 %v3280_v3, %v1663_v62  ;;  %v1701_v23 = vmax.f32 %v1685_v60, 0.0 }
 0x31e   : > { %v1615_v22 = vpop.permute.xlu0 %1614 }
 0x31f   : > { %v1702_v24 = vmax.f32 %v1686_v21, 0.0  ;;  %v1648_v53 = vadd.f32 %v1615_v22, %v3255_v58  ;;  %v2570_v22 = vld [vmem:[%s2845_s27 + $0x20] sm:$0xff] }
 0x320   : > { %v1617_v26 = vpop.permute.xlu1 %1616 }
 0x321   : > { %v1711_v14 = vpack.c.bf16 %v1702_v24, %v1701_v23  ;;  %v1664_v0 = vadd.f32 %v1648_v53, %v3273_v4  ;;  %v1649_v55 = vadd.f32 %v1617_v26, %v3261_v61  ;;  %v1723_v61 = vlaneseq }
 0x322   : > { %v1918_v23 = vunpack.c.l.bf16 %v2570_v22  ;;  %v1919_v26 = vunpack.c.h.bf16 %v2570_v22 }
 0x323   : > { %v1687_v1 = vadd.f32 %v3280_v3, %v1664_v0  ;;  %v1665_v25 = vadd.f32 %v1649_v55, %v3275_v9  ;;  %2301 = vmatmul.mubr.msk.bf16.gmra.mrb[56].mxu0 %vm1238_vm4, %v1711_v14  ;;  %v1724_v4 = vshrl.u32 %v1723_v61, 7  ;;  %v1721_v9 = vld [vmem:[%s3501_s8] sm:$0x3]  ;;  %v2571_v55 = vld [vmem:[%s2845_s27 + $0x28] sm:$0xff] }
 0x324   : > { %1899 = vmatprep.mubr.bf16.mxu0 %v2679_v30 }
 0x325   : > { %v1688_v27 = vadd.f32 %v3280_v3, %v1665_v25  ;;  %v1703_v28 = vmax.f32 %v1687_v1, 0.0  ;;  %v1725_v31 = vsub.s32 0, %v1724_v4  ;;  %v1729_v33 = vsub.s32 1, %v1724_v4  ;;  %v2566_v3 = vld [vmem:[%s2845_s27] sm:$0xff] }
 0x326   : > { %v1910_v38 = vunpack.c.l.bf16 %v2566_v3  ;;  %v1911_v32 = vunpack.c.h.bf16 %v2566_v3  ;;  %v1920_v1 = vunpack.c.l.bf16 %v2571_v55 }
 0x327   : > { %v1704_v58 = vmax.f32 %v1688_v27, 0.0  ;;  %v3340_v36 = vrot.slane %v1721_v9, %v1725_v31  ;;  %v3343_v30 = vrot.slane %v1721_v9, %v1729_v33 }
 0x329   : > { %v1712_v29 = vpack.c.bf16 %v1704_v58, %v1703_v28  ;;  %v1921_v28 = vunpack.c.h.bf16 %v2571_v55 }
 0x32b   : > { %2302 = vmatmul.mubr.msk.bf16.gmra.mrb[60].mxu0 %vm1238_vm4, %v1712_v29 }
 0x3c6   : > { %v1831_v40 = vpop.f32.mrb[32].mxu0 }
 0x3c7   : > { %v1832_v63 = vadd.f32 %v1831_v40, %v3340_v36  ;;  %v1833_v42 = vpop.f32.mrb[33].mxu0 }
 0x3c8   : > { %v1834_v44 = vadd.f32 %v1833_v42, %v3343_v30  ;;  %v1835_v2 = vpop.f32.mrb[34].mxu0 }
 0x3c9   : > { %v1942_v10 = vadd.f32 %v1910_v38, %v1832_v63  ;;  %v1836_v19 = vadd.f32 %v1835_v2, %v3340_v36  ;;  %v1837_v51 = vpop.f32.mrb[35].mxu0 }
 0x3ca   : > { %v1943_v7 = vadd.f32 %v1911_v32, %v1834_v44  ;;  %v1838_v15 = vadd.f32 %v1837_v51, %v3343_v30  ;;  %v2572_v32 = vld [vmem:[%s2845_s27 + $0x30] sm:$0xff] }
 0x3cb   : > { %v1974_v47 = vmax.f32 %v1942_v10, 0.0  ;;  %v1944_v39 = vadd.f32 %v1912_v57, %v1836_v19  ;;  %v1922_v63 = vunpack.c.l.bf16 %v2572_v32  ;;  %v1923_v57 = vunpack.c.h.bf16 %v2572_v32 }
 0x3cc   : > { %v1975_v49 = vmax.f32 %v1943_v7, 0.0  ;;  %v1945_v50 = vadd.f32 %v1913_v8, %v1838_v15  ;;  %v2573_v8 = vld [vmem:[%s2845_s27 + $0x38] sm:$0xff] }
 0x3cd   : > { %2006 = vst [vmem:[%s3353_s17] sm:$0xff] %v1974_v47  ;;  %v1976_v37 = vmax.f32 %v1944_v39, 0.0  ;;  %v1924_v10 = vunpack.c.l.bf16 %v2573_v8  ;;  %v1925_v7 = vunpack.c.h.bf16 %v2573_v8 }
 0x3ce   : > { %2007 = vst [vmem:[%s3353_s17 + $0x8] sm:$0xff] %v1975_v49  ;;  %v1977_v45 = vmax.f32 %v1945_v50, 0.0  ;;  %v1841_v41 = vpop.f32.mrb[36].mxu0 }
 0x3cf   : > { %2008 = vst [vmem:[%s3353_s17 + $0x10] sm:$0xff] %v1976_v37  ;;  %v1842_v35 = vadd.f32 %v1841_v41, %v3340_v36  ;;  %v1843_v54 = vpop.f32.mrb[37].mxu0 }
 0x3d0   : > { %2009 = vst [vmem:[%s3353_s17 + $0x18] sm:$0xff] %v1977_v45  ;;  %v1844_v56 = vadd.f32 %v1843_v54, %v3343_v30  ;;  %v1845_v6 = vpop.f32.mrb[38].mxu0 }
 0x3d1   : > { %v1946_v12 = vadd.f32 %v1914_v5, %v1842_v35  ;;  %v1846_v13 = vadd.f32 %v1845_v6, %v3340_v36  ;;  %v1847_v46 = vpop.f32.mrb[39].mxu0 }
 0x3d2   : > { %v1947_v17 = vadd.f32 %v1915_v11, %v1844_v56  ;;  %v1848_v20 = vadd.f32 %v1847_v46, %v3343_v30  ;;  %v2574_v11 = vld [vmem:[%s2845_s27 + $0x40] sm:$0xff] }
 0x3d3   : > { %v1978_v59 = vmax.f32 %v1946_v12, 0.0  ;;  %v1948_v48 = vadd.f32 %v1916_v18, %v1846_v13  ;;  %v1926_v35 = vunpack.c.l.bf16 %v2574_v11  ;;  %v1927_v18 = vunpack.c.h.bf16 %v2574_v11 }
 0x3d4   : > { %v1979_v60 = vmax.f32 %v1947_v17, 0.0  ;;  %v1949_v62 = vadd.f32 %v1917_v52, %v1848_v20  ;;  %v2575_v52 = vld [vmem:[%s2845_s27 + $0x48] sm:$0xff] }
 0x3d5   : > { %2010 = vst [vmem:[%s3353_s17 + $0x20] sm:$0xff] %v1978_v59  ;;  %v1980_v21 = vmax.f32 %v1948_v48, 0.0  ;;  %v1928_v12 = vunpack.c.l.bf16 %v2575_v52  ;;  %v1929_v17 = vunpack.c.h.bf16 %v2575_v52 }
 0x3d6   : > { %2011 = vst [vmem:[%s3353_s17 + $0x28] sm:$0xff] %v1979_v60  ;;  %v1981_v24 = vmax.f32 %v1949_v62, 0.0  ;;  %v1851_v53 = vpop.f32.mrb[40].mxu0 }
 0x3d7   : > { %2012 = vst [vmem:[%s3353_s17 + $0x30] sm:$0xff] %v1980_v21  ;;  %v1852_v14 = vadd.f32 %v1851_v53, %v3340_v36  ;;  %v1853_v0 = vpop.f32.mrb[41].mxu0 }
 0x3d8   : > { %2013 = vst [vmem:[%s3353_s17 + $0x38] sm:$0xff] %v1981_v24  ;;  %v1854_v25 = vadd.f32 %v1853_v0, %v3343_v30  ;;  %v1855_v27 = vpop.f32.mrb[42].mxu0 }
 0x3d9   : > { %v1950_v58 = vadd.f32 %v1918_v23, %v1852_v14  ;;  %v1856_v29 = vadd.f32 %v1855_v27, %v3340_v36  ;;  %v1857_v61 = vpop.f32.mrb[43].mxu0 }
 0x3da   : > { %v1951_v4 = vadd.f32 %v1919_v26, %v1854_v25  ;;  %v1858_v31 = vadd.f32 %v1857_v61, %v3343_v30  ;;  %v2576_v26 = vld [vmem:[%s2845_s27 + $0x50] sm:$0xff] }
 0x3db   : > { %v1982_v9 = vmax.f32 %v1950_v58, 0.0  ;;  %v1952_v33 = vadd.f32 %v1920_v1, %v1856_v29  ;;  %v1930_v14 = vunpack.c.l.bf16 %v2576_v26  ;;  %v1931_v1 = vunpack.c.h.bf16 %v2576_v26 }
 0x3dc   : > { %v1983_v3 = vmax.f32 %v1951_v4, 0.0  ;;  %v1953_v38 = vadd.f32 %v1921_v28, %v1858_v31  ;;  %v2577_v28 = vld [vmem:[%s2845_s27 + $0x58] sm:$0xff] }
 0x3dd   : > { %2014 = vst [vmem:[%s3353_s17 + $0x40] sm:$0xff] %v1982_v9  ;;  %v1984_v40 = vmax.f32 %v1952_v33, 0.0  ;;  %v1932_v58 = vunpack.c.l.bf16 %v2577_v28  ;;  %v1933_v4 = vunpack.c.h.bf16 %v2577_v28 }
 0x3de   : > { %2015 = vst [vmem:[%s3353_s17 + $0x48] sm:$0xff] %v1983_v3  ;;  %v1985_v42 = vmax.f32 %v1953_v38, 0.0  ;;  %v1861_v34 = vpop.f32.mrb[44].mxu0 }
 0x3df   : > { %2016 = vst [vmem:[%s3353_s17 + $0x50] sm:$0xff] %v1984_v40  ;;  %v1862_v44 = vadd.f32 %v1861_v34, %v3340_v36  ;;  %v1863_v2 = vpop.f32.mrb[45].mxu0 }
 0x3e0   : > { %2017 = vst [vmem:[%s3353_s17 + $0x58] sm:$0xff] %v1985_v42  ;;  %v1864_v19 = vadd.f32 %v1863_v2, %v3343_v30  ;;  %v1865_v51 = vpop.f32.mrb[46].mxu0 }
 0x3e1   : > { %v1954_v15 = vadd.f32 %v1922_v63, %v1862_v44  ;;  %v1866_v47 = vadd.f32 %v1865_v51, %v3340_v36  ;;  %v1867_v39 = vpop.f32.mrb[47].mxu0 }
 0x3e2   : > { %v1955_v49 = vadd.f32 %v1923_v57, %v1864_v19  ;;  %v1868_v50 = vadd.f32 %v1867_v39, %v3343_v30  ;;  %v2578_v57 = vld [vmem:[%s2845_s27 + $0x60] sm:$0xff] }
 0x3e3   : > { %v1986_v37 = vmax.f32 %v1954_v15, 0.0  ;;  %v1956_v16 = vadd.f32 %v1924_v10, %v1866_v47  ;;  %v1934_v44 = vunpack.c.l.bf16 %v2578_v57  ;;  %v1935_v10 = vunpack.c.h.bf16 %v2578_v57 }
 0x3e4   : > { %v1987_v5 = vmax.f32 %v1955_v49, 0.0  ;;  %v1957_v45 = vadd.f32 %v1925_v7, %v1868_v50  ;;  %v2579_v7 = vld [vmem:[%s2845_s27 + $0x68] sm:$0xff] }
 0x3e5   : > { %2018 = vst [vmem:[%s3353_s17 + $0x60] sm:$0xff] %v1986_v37  ;;  %v1988_v41 = vmax.f32 %v1956_v16, 0.0  ;;  %v1936_v15 = vunpack.c.l.bf16 %v2579_v7  ;;  %v1937_v49 = vunpack.c.h.bf16 %v2579_v7 }
 0x3e6   : > { %2019 = vst [vmem:[%s3353_s17 + $0x68] sm:$0xff] %v1987_v5  ;;  %v1989_v54 = vmax.f32 %v1957_v45, 0.0  ;;  %v1871_v43 = vpop.f32.mrb[48].mxu0 }
 0x3e7   : > { %2020 = vst [vmem:[%s3353_s17 + $0x70] sm:$0xff] %v1988_v41  ;;  %v1872_v56 = vadd.f32 %v1871_v43, %v3340_v36  ;;  %v1873_v6 = vpop.f32.mrb[49].mxu0 }
 0x3e8   : > { %2021 = vst [vmem:[%s3353_s17 + $0x78] sm:$0xff] %v1989_v54  ;;  %v1874_v13 = vadd.f32 %v1873_v6, %v3343_v30  ;;  %v1875_v46 = vpop.f32.mrb[50].mxu0 }
 0x3e9   : > { %v1958_v20 = vadd.f32 %v1926_v35, %v1872_v56  ;;  %v1876_v59 = vadd.f32 %v1875_v46, %v3340_v36  ;;  %v1877_v48 = vpop.f32.mrb[51].mxu0 }
 0x3ea   : > { %v1959_v60 = vadd.f32 %v1927_v18, %v1874_v13  ;;  %v1878_v62 = vadd.f32 %v1877_v48, %v3343_v30  ;;  %v2580_v18 = vld [vmem:[%s2845_s27 + $0x70] sm:$0xff] }
 0x3eb   : > { %v1990_v21 = vmax.f32 %v1958_v20, 0.0  ;;  %v1960_v22 = vadd.f32 %v1928_v12, %v1876_v59  ;;  %v1938_v56 = vunpack.c.l.bf16 %v2580_v18  ;;  %v1939_v12 = vunpack.c.h.bf16 %v2580_v18 }
 0x3ec   : > { %v1991_v23 = vmax.f32 %v1959_v60, 0.0  ;;  %v1961_v24 = vadd.f32 %v1929_v17, %v1878_v62  ;;  %v2581_v17 = vld [vmem:[%s2845_s27 + $0x78] sm:$0xff]  ;;  %s2307_s27 = sshll.u32 %s2052_s12, 7 }
 0x3ed   : > { %2022 = vst [vmem:[%s3353_s17 + $0x80] sm:$0xff] %v1990_v21  ;;  %v1992_v53 = vmax.f32 %v1960_v22, 0.0  ;;  %v1940_v20 = vunpack.c.l.bf16 %v2581_v17  ;;  %v1941_v60 = vunpack.c.h.bf16 %v2581_v17  ;;  %s3435_s14 = scalar_lea.hbm %s3502_s9, %s2307_s27 }
 0x3ee   : > { %2023 = vst [vmem:[%s3353_s17 + $0x88] sm:$0xff] %v1991_v23  ;;  %v1993_v0 = vmax.f32 %v1961_v24, 0.0  ;;  %v1881_v55 = vpop.f32.mrb[52].mxu0 }
 0x3ef   : > { %2024 = vst [vmem:[%s3353_s17 + $0x90] sm:$0xff] %v1992_v53  ;;  %v1882_v25 = vadd.f32 %v1881_v55, %v3340_v36  ;;  %v1883_v27 = vpop.f32.mrb[53].mxu0 }
 0x3f0   : > { %2025 = vst [vmem:[%s3353_s17 + $0x98] sm:$0xff] %v1993_v0  ;;  %v1884_v29 = vadd.f32 %v1883_v27, %v3343_v30  ;;  %v1885_v61 = vpop.f32.mrb[54].mxu0 }
 0x3f1   : > { %v1962_v31 = vadd.f32 %v1930_v14, %v1882_v25  ;;  %v1886_v9 = vadd.f32 %v1885_v61, %v3340_v36  ;;  %v1887_v33 = vpop.f32.mrb[55].mxu0 }
 0x3f2   : > { %v1963_v3 = vadd.f32 %v1931_v1, %v1884_v29  ;;  %v1888_v38 = vadd.f32 %v1887_v33, %v3343_v30 }
 0x3f3   : > { %v1994_v40 = vmax.f32 %v1962_v31, 0.0  ;;  %v1964_v32 = vadd.f32 %v1932_v58, %v1886_v9 }
 0x3f4   : > { %v1995_v63 = vmax.f32 %v1963_v3, 0.0  ;;  %v1965_v42 = vadd.f32 %v1933_v4, %v1888_v38 }
 0x3f5   : > { %2026 = vst [vmem:[%s3353_s17 + $0xa0] sm:$0xff] %v1994_v40  ;;  %v1996_v34 = vmax.f32 %v1964_v32, 0.0 }
 0x3f6   : > { %2027 = vst [vmem:[%s3353_s17 + $0xa8] sm:$0xff] %v1995_v63  ;;  %v1997_v2 = vmax.f32 %v1965_v42, 0.0  ;;  %v1891_v8 = vpop.f32.mrb[56].mxu0 }
 0x3f7   : > { %2028 = vst [vmem:[%s3353_s17 + $0xb0] sm:$0xff] %v1996_v34  ;;  %v1892_v19 = vadd.f32 %v1891_v8, %v3340_v36  ;;  %v1893_v51 = vpop.f32.mrb[57].mxu0 }
 0x3f8   : > { %2029 = vst [vmem:[%s3353_s17 + $0xb8] sm:$0xff] %v1997_v2  ;;  %v1894_v47 = vadd.f32 %v1893_v51, %v3343_v30  ;;  %v1895_v39 = vpop.f32.mrb[58].mxu0 }
 0x3f9   : > { %v1966_v50 = vadd.f32 %v1934_v44, %v1892_v19  ;;  %v1896_v37 = vadd.f32 %v1895_v39, %v3340_v36  ;;  %v1897_v16 = vpop.f32.mrb[59].mxu0 }
 0x3fa   : > { %v1967_v5 = vadd.f32 %v1935_v10, %v1894_v47  ;;  %v1898_v45 = vadd.f32 %v1897_v16, %v3343_v30 }
 0x3fb   : > { %v1998_v41 = vmax.f32 %v1966_v50, 0.0  ;;  %v1968_v11 = vadd.f32 %v1936_v15, %v1896_v37 }
 0x3fc   : > { %v1999_v35 = vmax.f32 %v1967_v5, 0.0  ;;  %v1969_v54 = vadd.f32 %v1937_v49, %v1898_v45 }
 0x3fd   : > { %2030 = vst [vmem:[%s3353_s17 + $0xc0] sm:$0xff] %v1998_v41  ;;  %v2000_v43 = vmax.f32 %v1968_v11, 0.0 }
 0x3fe   : > { %2031 = vst [vmem:[%s3353_s17 + $0xc8] sm:$0xff] %v1999_v35  ;;  %v2001_v6 = vmax.f32 %v1969_v54, 0.0  ;;  %v1901_v52 = vpop.f32.mrb[60].mxu0 }
 0x3ff   : > { %2032 = vst [vmem:[%s3353_s17 + $0xd0] sm:$0xff] %v2000_v43  ;;  %v1902_v13 = vadd.f32 %v1901_v52, %v3340_v36  ;;  %v1903_v46 = vpop.f32.mrb[61].mxu0 }
 0x400   : > { %2033 = vst [vmem:[%s3353_s17 + $0xd8] sm:$0xff] %v2001_v6  ;;  %v1904_v59 = vadd.f32 %v1903_v46, %v3343_v30  ;;  %v1905_v48 = vpop.f32.mrb[62].mxu0 }
 0x401   : > { %v1970_v62 = vadd.f32 %v1938_v56, %v1902_v13  ;;  %v1906_v21 = vadd.f32 %v1905_v48, %v3340_v36  ;;  %v1907_v22 = vpop.f32.mrb[63].mxu0 }
 0x402   : > { %v1971_v23 = vadd.f32 %v1939_v12, %v1904_v59  ;;  %v1908_v24 = vadd.f32 %v1907_v22, %v3343_v30 }
 0x403   : > { %v2002_v53 = vmax.f32 %v1970_v62, 0.0  ;;  %v1972_v26 = vadd.f32 %v1940_v20, %v1906_v21 }
 0x404   : > { %v2003_v14 = vmax.f32 %v1971_v23, 0.0  ;;  %v1973_v0 = vadd.f32 %v1941_v60, %v1908_v24 }
 0x405   : > { %2034 = vst [vmem:[%s3353_s17 + $0xe0] sm:$0xff] %v2002_v53  ;;  %v2004_v55 = vmax.f32 %v1972_v26, 0.0 }
 0x406   : > { %2035 = vst [vmem:[%s3353_s17 + $0xe8] sm:$0xff] %v2003_v14  ;;  %v2005_v36 = vmax.f32 %v1973_v0, 0.0 }
 0x407   : > { %2036 = vst [vmem:[%s3353_s17 + $0xf0] sm:$0xff] %v2004_v55 }
 0x408   : > { %2037 = vst [vmem:[%s3353_s17 + $0xf8] sm:$0xff] %v2005_v36 }
 0x409   : > { %2595 = shalt.err (!%p2592_p13)
}
 0x40a   : > { %s2596_s15 = scalar_lea.hbm %s3435_s14, 4096  ;;  %s2600_s20 = scalar_lea.hbm %s3502_s9, 16384 }
 0x40b   : > { %p2597_p0 = scmp.ne.s32.totalorder %s3435_s14, %s2596_s15  ;;  %p2601_p4 = scmp.lt.u32.totalorder %s3435_s14, %s3502_s9 }
 0x40c   : > { %p2602_p5 = scmp.lt.u32.totalorder %s2600_s20, %s2596_s15  ;;  %p2604_p7 = scmp.lt.u32.totalorder %s2596_s15, %s3435_s14 }
 0x40d   : > { %p2598_p1 = pnand %p2597_p0, %p2784_p3 }
 0x40e   : > { %p2603_p6 = por %p2602_p5, %p2601_p4 }
 0x40f   : > { %p2599_p2 = pneg %p2598_p1 }
 0x410   : > { %p2605_p9 = por %p2604_p7, %p2603_p6 }
 0x412   : > { %p2606_p10 = pnand %p2605_p9, %p2599_p2 }
 0x414   : > { %2609 = shalt.err (!%p2606_p10)
}
 0x415   : > { %s2681_s27 = smov 256   ;;  %s2682_s18 = smov 16  }
 0x416   : > { %2405 = dma.vmem_to_hbm [thread:$0]  (%p2784_p3), %s3429_s13, 4096, %s3435_s14, %s3441_s25, %s2681_s27, %s2681_s27, %s2682_s18  }
 0x417 PF: > { %p2411_p11 = scmp.ge.s32.totalorder %s2676_s16, 2  ;;  %s2070_s21 = sand.u32 1, %s2648_s30  }
 0x418   : > { %s2071_s28 = scalar_lea.sflag [#allocation3], %s2070_s21 }
 0x419   : > { %p2408_p12 = pnand %p2411_p11, %p2793_p8 }
 0x41b   : > { %2643 = dma.done.wait (!%p2408_p12), %s2071_s28, 4096  }
 0x41c   : > { %2645 = vsyncadd (!%p2408_p12), %s2071_s28, 4294963200  ;;  %s22_s16 = sadd.s32 1, %s2676_s16   ;;  %s3519_s19 = sld [smem:[#allocation5_spill]] }
 0x41d   : > { %p19_p13 = scmp.ge.s32.totalorder %s22_s16, 6   ;;  %s3520_s11 = sld [smem:[#allocation10_spill]] }
 0x41e   : > { %s3521_s12 = sld [smem:[#allocation6_spill]]  ;;  %s3522_s13 = sld [smem:[#allocation7_spill]] }
 0x41f   : > { %s3523_s14 = sld [smem:[#allocation8_spill]]  ;;  %s3524_s15 = sld [smem:[#allocation9_spill]] }
 0x420   : > { %s3525_s30 = smov %s2652_s10  ;;  %21 = sbr.rel (!%p19_p13) target bundleno = 5 (0x5), region = 97 }
 0x422   : > { %s3526_s10 = smov %s3519_s19 }
 0x427   :  { %2076 = vsyncpa [#allocation3], 1 }
 0x428   :  { %2078 = vsyncpa [#allocation3 + $0x1], 1 }

</bundles_post_ra>
